<compile_context>
chip_gen: v5e
topology: v5e:2x2
jax: 0.10.0
libtpu: 0.0.40
codegen_flags: <defaults>
</compile_context>

<pallas_src>
import math
import numpy as np
import jax
import jax.numpy as jnp
from jax.experimental import pallas as pl
from jax.experimental.pallas import tpu as pltpu

NEG_SLOPE = 0.2
pad_convt = lambda k, s: int(math.ceil((k - s) / 2))
out_pad_convt = lambda k, s: 2 * pad_convt(k, s) - (k - s)


# ----------------------------------------------------------------------------
# Pallas kernel: full DownResCNN forward for one batch block, fused.
#   refs = [x_ref, (A, B, bias) * 7, o_ref]
#     x_ref : (H, NB*W*C)              f32   channels fastest in the lane dim
#     A     : (k, Ho, Hi)              bf16  0/1 row-selection per kernel-row tap
#     B     : (k, NB*Wi*Ci, NB*Wo*Co)  bf16  block-diag banded weight matrix
#     bias  : (1, NB*Wo*Co)            f32   bias tiled over the output row
#     o_ref : (H, NB*W*C)              f32
# ----------------------------------------------------------------------------
def _down_res_cnn_kernel(*refs):
    x_ref, o_ref = refs[0], refs[-1]
    lrefs = refs[1:-1]

    def layer(act_f32, a_ref, b_ref, bias_ref, residual=None):
        act_bf = act_f32.astype(jnp.bfloat16)          # bf16 only for the MXU
        acc = None
        for ky in range(a_ref.shape[0]):               # unrolled: 3 taps
            rows = jnp.dot(a_ref[ky], act_bf,
                           preferred_element_type=jnp.float32)
            part = jnp.dot(rows.astype(jnp.bfloat16), b_ref[ky],
                           preferred_element_type=jnp.float32)
            acc = part if acc is None else acc + part
        acc = acc + bias_ref[...]                           # (1, NB*Wo*Co) bcast
        acc = jnp.where(acc >= 0.0, acc, NEG_SLOPE * acc)   # LeakyReLU(0.2)
        if residual is not None:                            # no zero residual
            acc = acc + residual
        return acc

    x = x_ref[...]
    X1 = layer(x,  *lrefs[0:3])
    X2 = layer(X1, *lrefs[3:6])
    X3 = layer(X2, *lrefs[6:9])
    Y3 = layer(X3, *lrefs[9:12],  residual=X3)
    Y2 = layer(Y3, *lrefs[12:15], residual=X2)
    Y1 = layer(Y2, *lrefs[15:18], residual=X1)
    o_ref[...] = layer(Y1, *lrefs[18:21], residual=x)


# ----------------------------------------------------------------------------
# Operand construction (tiny, done once in the wrapper)
# ----------------------------------------------------------------------------
def _row_select_conv(H_in, H_out, k, s, p):
    A = np.zeros((k, H_out, H_in), np.float32)
    for ky in range(k):
        for oy in range(H_out):
            iy = oy * s + ky - p
            if 0 <= iy < H_in:
                A[ky, oy, iy] = 1.0
    return A


def _row_select_convt(H_in, H_out, k, s, p):
    A = np.zeros((k, H_out, H_in), np.float32)
    for ky in range(k):
        for oy in range(H_out):
            t = oy + p - ky
            if t % s == 0 and 0 <= t // s < H_in:
                A[ky, oy, t // s] = 1.0
    return A


def _col_struct_conv(W_in, W_out, k, s, p):
    # S[kx, ix, ox] = 1  iff  ix == ox*s + kx - p
    S = np.zeros((k, W_in, W_out), np.float32)
    for ox in range(W_out):
        for kx in range(k):
            ix = ox * s + kx - p
            if 0 <= ix < W_in:
                S[kx, ix, ox] = 1.0
    return S


def _col_struct_convt(W_in, W_out, k, s, p):
    # S[kx, ix, ox] = 1  iff  ox == ix*s + kx - p
    S = np.zeros((k, W_in, W_out), np.float32)
    for ix in range(W_in):
        for kx in range(k):
            ox = ix * s + kx - p
            if 0 <= ox < W_out:
                S[kx, ix, ox] = 1.0
    return S


def _layer_operands(w, b, *, transposed, H_in, W_in, stride, pad,
                    out_pad=0, k=3, nb=1):
    """Build (A, B_blockdiag, bias_row) for one conv / conv-transpose layer."""
    if transposed:
        Cin, Cout = w.shape[0], w.shape[1]
        H_out = (H_in - 1) * stride - 2 * pad + k + out_pad
        W_out = (W_in - 1) * stride - 2 * pad + k + out_pad
        w_perm = jnp.transpose(w, (2, 3, 0, 1))      # (ky, kx, Cin, Cout)
        A = _row_select_convt(H_in, H_out, k, stride, pad)
        S = _col_struct_convt(W_in, W_out, k, stride, pad)
    else:
        Cout, Cin = w.shape[0], w.shape[1]
        H_out = (H_in + 2 * pad - k) // stride + 1
        W_out = (W_in + 2 * pad - k) // stride + 1
        w_perm = jnp.transpose(w, (2, 3, 1, 0))      # (ky, kx, Cin, Cout)
        A = _row_select_conv(H_in, H_out, k, stride, pad)
        S = _col_struct_conv(W_in, W_out, k, stride, pad)
    # B[ky, ix*Cin+ci, ox*Cout+co] = sum_kx S[kx,ix,ox] * w_perm[ky,kx,ci,co]
    B = jnp.einsum('kwo,ykcd->ywcod', jnp.asarray(S), w_perm)
    B = B.reshape(k, W_in * Cin, W_out * Cout)
    if nb > 1:
        # Block-diagonal over the NB lane-packed samples (shared weights).
        eye_nb = jnp.eye(nb, dtype=B.dtype)
        B = jnp.einsum('st,kab->ksatb', eye_nb, B).reshape(
            k, nb * W_in * Cin, nb * W_out * Cout)
    bias_row = jnp.tile(b, nb * W_out)[None, :]
    return (jnp.asarray(A, jnp.bfloat16), B.astype(jnp.bfloat16),
            bias_row.astype(jnp.float32), H_out, W_out)


def _pick_batch_block(N, wc, target_lanes=128, max_nb=8):
    """Smallest divisor of N whose lane width nb*wc reaches target_lanes,
    else the largest divisor <= max_nb."""
    best = 1
    for nb in range(1, min(N, max_nb) + 1):
        if N % nb:
            continue
        best = nb
        if nb * wc >= target_lanes:
            break
    return best


# ----------------------------------------------------------------------------
# DownResCNN forward (NCHW in / NCHW out, like the PyTorch module)
# ----------------------------------------------------------------------------
def down_res_cnn_forward(x_nchw, params, filter_size=3):
    N, C, H, W = x_nchw.shape
    p2 = pad_convt(filter_size, 2)
    p1 = pad_convt(filter_size, 1)
    op2 = out_pad_convt(filter_size, 2)

    # Pack NB samples along the lane dim so the output tile is lane-dense
    # (NB*W*C is a multiple of 128 at the demo shape -> unmasked stores).
    NB = _pick_batch_block(N, W * C)
    G = N // NB

    # NCHW -> per-block (H, NB*W*C) slab, channels fastest in the lane dim.
    x_nhwc = jnp.transpose(x_nchw, (0, 2, 3, 1)).astype(jnp.float32)
    x2d = (x_nhwc.reshape(G, NB, H, W, C)
                 .transpose(0, 2, 1, 3, 4)
                 .reshape(G, H, NB * W * C))

    layer_cfg = [
        ("X1",  False, 2, p2, 0),
        ("X2",  False, 2, p2, 0),
        ("X3",  False, 2, p2, 0),
        ("Y3",  False, 1, p1, 0),
        ("Y2",  True,  2, p2, op2),
        ("Y1",  True,  2, p2, op2),
        ("net", True,  2, p2, op2),
    ]
    operands = []
    h, w = H, W
    for name, transposed, stride, pad, opad in layer_cfg:
        wgt, bias = params[name]
        A, B, brow, h, w = _layer_operands(
            wgt, bias, transposed=transposed, H_in=h, W_in=w,
            stride=stride, pad=pad, out_pad=opad, k=filter_size, nb=NB)
        operands += [A, B, brow]
    assert (h, w) == (H, W), "network must restore the input resolution"

    act_spec = pl.BlockSpec((None, H, NB * W * C), lambda g: (g, 0, 0))
    in_specs = [act_spec]
    for op in operands:   # full-array blocks, same block every grid step
        in_specs.append(
            pl.BlockSpec(op.shape, lambda g, _nd=op.ndim: (0,) * _nd))

    out2d = pl.pallas_call(
        _down_res_cnn_kernel,
        out_shape=jax.ShapeDtypeStruct((G, H, NB * W * C), jnp.float32),
        grid=(G,),
        in_specs=in_specs,
        out_specs=act_spec,
        compiler_params=pltpu.CompilerParams(
            dimension_semantics=("parallel",)),   # batch blocks across TCs
    )(x2d, *operands)

    out = (out2d.reshape(G, H, NB, W, C)
                 .transpose(0, 2, 1, 3, 4)
                 .reshape(N, H, W, C))
    return jnp.transpose(out, (0, 3, 1, 2))       # NHWC -> NCHW


# ----------------------------------------------------------------------------
# Parameter init (matches torch Conv2d / ConvTranspose2d default init shape)
# ----------------------------------------------------------------------------
def init_params(key, feat_num, filter_size=3):
    names = ["X1", "X2", "X3", "Y3", "Y2", "Y1", "net"]
    params = {}
    fan_in = feat_num * filter_size * filter_size
    bound = 1.0 / math.sqrt(fan_in)
    for name in names:
        key, kw, kb = jax.random.split(key, 3)
        # Conv2d weights are (Cout, Cin, k, k); ConvTranspose2d are
        # (Cin, Cout, k, k) -- identical shape here since Cin == Cout.
        wgt = jax.random.uniform(kw, (feat_num, feat_num, filter_size, filter_size),
                                 jnp.float32, -bound, bound)
        b = jax.random.uniform(kb, (feat_num,), jnp.float32, -bound, bound)
        params[name] = (wgt, b)
    return params


# ----------------------------------------------------------------------------
# Pure-JAX reference (for a loose bf16-tolerance sanity check)
# ----------------------------------------------------------------------------
def _ref_forward(x, params, filter_size=3):
    p2 = pad_convt(filter_size, 2)
    p1 = pad_convt(filter_size, 1)
    op2 = out_pad_convt(filter_size, 2)
    dn = ('NCHW', 'OIHW', 'NCHW')
    lrelu = lambda y: jnp.where(y >= 0, y, NEG_SLOPE * y)

    def conv(h, wgt, b, stride, pad):
        y = jax.lax.conv_general_dilated(h, wgt, (stride, stride),
                                         [(pad, pad), (pad, pad)],
                                         dimension_numbers=dn)
        return lrelu(y + b[None, :, None, None])

    def convt(h, wgt, b, stride, pad, opad, k=filter_size):
        w_eq = jnp.transpose(jnp.flip(wgt, axis=(2, 3)), (1, 0, 2, 3))
        lo, hi = k - 1 - pad, k - 1 - pad + opad
        y = jax.lax.conv_general_dilated(h, w_eq, (1, 1),
                                         [(lo, hi), (lo, hi)],
                                         lhs_dilation=(stride, stride),
                                         dimension_numbers=dn)
        return lrelu(y + b[None, :, None, None])

    X1 = conv(x,  *params["X1"], 2, p2)
    X2 = conv(X1, *params["X2"], 2, p2)
    X3 = conv(X2, *params["X3"], 2, p2)
    Y3 = conv(X3, *params["Y3"], 1, p1) + X3
    Y2 = convt(Y3, *params["Y2"], 2, p2, op2) + X2
    Y1 = convt(Y2, *params["Y1"], 2, p2, op2) + X1
    return convt(Y1, *params["net"], 2, p2, op2) + x


if __name__ == "__main__":
    key = jax.random.PRNGKey(0)
    key, kx = jax.random.split(key)

    N, C, H, W = 2, 4, 16, 16          # H, W divisible by 8 (3 downsamples)
    x = jax.random.normal(kx, (N, C, H, W), jnp.float32)   # NCHW, as in torch

    params = init_params(key, feat_num=C, filter_size=3)

    fwd = jax.jit(lambda xx: down_res_cnn_forward(xx, params))
    out = fwd(x)
    jax.block_until_ready(out)

    ref = _ref_forward(x, params)
    err = float(jnp.max(jnp.abs(out - ref)))

    assert out.shape == (N, C, H, W), out.shape
    assert jnp.all(jnp.isfinite(out))
    assert err < 0.1, f"mismatch vs reference: max abs err {err}"
    print("KERNEL_OK")
</pallas_src>

<mosaic_0001>
module attributes {stable_mosaic.version = 11 : i64} {
  func.func @_down_res_cnn_kernel(%arg0: i32, %arg1: memref<1x16x128xf32, #tpu.memory_space<vmem>>, %arg2: memref<3x8x16xbf16, #tpu.memory_space<vmem>>, %arg3: memref<3x128x64xbf16, #tpu.memory_space<vmem>>, %arg4: memref<1x64xf32, #tpu.memory_space<vmem>>, %arg5: memref<3x4x8xbf16, #tpu.memory_space<vmem>>, %arg6: memref<3x64x32xbf16, #tpu.memory_space<vmem>>, %arg7: memref<1x32xf32, #tpu.memory_space<vmem>>, %arg8: memref<3x2x4xbf16, #tpu.memory_space<vmem>>, %arg9: memref<3x32x16xbf16, #tpu.memory_space<vmem>>, %arg10: memref<1x16xf32, #tpu.memory_space<vmem>>, %arg11: memref<3x2x2xbf16, #tpu.memory_space<vmem>>, %arg12: memref<3x16x16xbf16, #tpu.memory_space<vmem>>, %arg13: memref<1x16xf32, #tpu.memory_space<vmem>>, %arg14: memref<3x4x2xbf16, #tpu.memory_space<vmem>>, %arg15: memref<3x16x32xbf16, #tpu.memory_space<vmem>>, %arg16: memref<1x32xf32, #tpu.memory_space<vmem>>, %arg17: memref<3x8x4xbf16, #tpu.memory_space<vmem>>, %arg18: memref<3x32x64xbf16, #tpu.memory_space<vmem>>, %arg19: memref<1x64xf32, #tpu.memory_space<vmem>>, %arg20: memref<3x16x8xbf16, #tpu.memory_space<vmem>>, %arg21: memref<3x64x128xbf16, #tpu.memory_space<vmem>>, %arg22: memref<1x128xf32, #tpu.memory_space<vmem>>, %arg23: memref<1x16x128xf32, #tpu.memory_space<vmem>>) attributes {dimension_semantics = [#tpu.dimension_semantics<parallel>], iteration_bounds = array<i64: 1>, scalar_prefetch = 0 : i64, scratch_operands = 0 : i64, tpu.core_type = #tpu.core_type<tc>, window_params = [{transform_indices = @transform_0, window_bounds = array<i64: 1, 16, 128>}, {pipeline_mode = #tpu.pipeline_mode<synchronous>, transform_indices = @transform_1, window_bounds = array<i64: 3, 8, 16>}, {pipeline_mode = #tpu.pipeline_mode<synchronous>, transform_indices = @transform_2, window_bounds = array<i64: 3, 128, 64>}, {pipeline_mode = #tpu.pipeline_mode<synchronous>, transform_indices = @transform_3, window_bounds = array<i64: 1, 64>}, {pipeline_mode = #tpu.pipeline_mode<synchronous>, transform_indices = @transform_4, window_bounds = array<i64: 3, 4, 8>}, {pipeline_mode = #tpu.pipeline_mode<synchronous>, transform_indices = @transform_5, window_bounds = array<i64: 3, 64, 32>}, {pipeline_mode = #tpu.pipeline_mode<synchronous>, transform_indices = @transform_6, window_bounds = array<i64: 1, 32>}, {pipeline_mode = #tpu.pipeline_mode<synchronous>, transform_indices = @transform_7, window_bounds = array<i64: 3, 2, 4>}, {pipeline_mode = #tpu.pipeline_mode<synchronous>, transform_indices = @transform_8, window_bounds = array<i64: 3, 32, 16>}, {pipeline_mode = #tpu.pipeline_mode<synchronous>, transform_indices = @transform_9, window_bounds = array<i64: 1, 16>}, {pipeline_mode = #tpu.pipeline_mode<synchronous>, transform_indices = @transform_10, window_bounds = array<i64: 3, 2, 2>}, {pipeline_mode = #tpu.pipeline_mode<synchronous>, transform_indices = @transform_11, window_bounds = array<i64: 3, 16, 16>}, {pipeline_mode = #tpu.pipeline_mode<synchronous>, transform_indices = @transform_12, window_bounds = array<i64: 1, 16>}, {pipeline_mode = #tpu.pipeline_mode<synchronous>, transform_indices = @transform_13, window_bounds = array<i64: 3, 4, 2>}, {pipeline_mode = #tpu.pipeline_mode<synchronous>, transform_indices = @transform_14, window_bounds = array<i64: 3, 16, 32>}, {pipeline_mode = #tpu.pipeline_mode<synchronous>, transform_indices = @transform_15, window_bounds = array<i64: 1, 32>}, {pipeline_mode = #tpu.pipeline_mode<synchronous>, transform_indices = @transform_16, window_bounds = array<i64: 3, 8, 4>}, {pipeline_mode = #tpu.pipeline_mode<synchronous>, transform_indices = @transform_17, window_bounds = array<i64: 3, 32, 64>}, {pipeline_mode = #tpu.pipeline_mode<synchronous>, transform_indices = @transform_18, window_bounds = array<i64: 1, 64>}, {pipeline_mode = #tpu.pipeline_mode<synchronous>, transform_indices = @transform_19, window_bounds = array<i64: 3, 16, 8>}, {pipeline_mode = #tpu.pipeline_mode<synchronous>, transform_indices = @transform_20, window_bounds = array<i64: 3, 64, 128>}, {pipeline_mode = #tpu.pipeline_mode<synchronous>, transform_indices = @transform_21, window_bounds = array<i64: 1, 128>}, {transform_indices = @transform_22, window_bounds = array<i64: 1, 16, 128>}]} {
    %c0 = arith.constant 0 : index
    %c0_0 = arith.constant 0 : index
    %c0_1 = arith.constant 0 : index
    %0 = vector.load %arg1[%c0, %c0_0, %c0_1] : memref<1x16x128xf32, #tpu.memory_space<vmem>>, vector<1x16x128xf32>
    %1 = vector.shape_cast %0 : vector<1x16x128xf32> to vector<16x128xf32>
    %2 = arith.truncf %1 : vector<16x128xf32> to vector<16x128xbf16>
    %c0_2 = arith.constant 0 : index
    %c0_3 = arith.constant 0 : index
    %c0_4 = arith.constant 0 : index
    %3 = vector.load %arg2[%c0_2, %c0_3, %c0_4] : memref<3x8x16xbf16, #tpu.memory_space<vmem>>, vector<1x8x16xbf16>
    %4 = vector.shape_cast %3 : vector<1x8x16xbf16> to vector<8x16xbf16>
    %cst = arith.constant dense<0.000000e+00> : vector<8x128xf32>
    %5 = tpu.matmul %4, %2, %cst {dimension_numbers = #tpu.dot_dimension_numbers<[1], [0], [0], [1], [0, 0, 1, 1], [], []>} : vector<8x16xbf16>, vector<16x128xbf16>, vector<8x128xf32> -> vector<8x128xf32>
    %6 = arith.truncf %5 : vector<8x128xf32> to vector<8x128xbf16>
    %c0_5 = arith.constant 0 : index
    %c0_6 = arith.constant 0 : index
    %c0_7 = arith.constant 0 : index
    %7 = vector.load %arg3[%c0_5, %c0_6, %c0_7] : memref<3x128x64xbf16, #tpu.memory_space<vmem>>, vector<1x128x64xbf16>
    %8 = vector.shape_cast %7 : vector<1x128x64xbf16> to vector<128x64xbf16>
    %cst_8 = arith.constant dense<0.000000e+00> : vector<8x64xf32>
    %9 = tpu.matmul %6, %8, %cst_8 {dimension_numbers = #tpu.dot_dimension_numbers<[1], [0], [0], [1], [0, 0, 1, 1], [], []>} : vector<8x128xbf16>, vector<128x64xbf16>, vector<8x64xf32> -> vector<8x64xf32>
    %c1 = arith.constant 1 : index
    %c0_9 = arith.constant 0 : index
    %c0_10 = arith.constant 0 : index
    %10 = vector.load %arg2[%c1, %c0_9, %c0_10] : memref<3x8x16xbf16, #tpu.memory_space<vmem>>, vector<1x8x16xbf16>
    %11 = vector.shape_cast %10 : vector<1x8x16xbf16> to vector<8x16xbf16>
    %cst_11 = arith.constant dense<0.000000e+00> : vector<8x128xf32>
    %12 = tpu.matmul %11, %2, %cst_11 {dimension_numbers = #tpu.dot_dimension_numbers<[1], [0], [0], [1], [0, 0, 1, 1], [], []>} : vector<8x16xbf16>, vector<16x128xbf16>, vector<8x128xf32> -> vector<8x128xf32>
    %13 = arith.truncf %12 : vector<8x128xf32> to vector<8x128xbf16>
    %c1_12 = arith.constant 1 : index
    %c0_13 = arith.constant 0 : index
    %c0_14 = arith.constant 0 : index
    %14 = vector.load %arg3[%c1_12, %c0_13, %c0_14] : memref<3x128x64xbf16, #tpu.memory_space<vmem>>, vector<1x128x64xbf16>
    %15 = vector.shape_cast %14 : vector<1x128x64xbf16> to vector<128x64xbf16>
    %cst_15 = arith.constant dense<0.000000e+00> : vector<8x64xf32>
    %16 = tpu.matmul %13, %15, %cst_15 {dimension_numbers = #tpu.dot_dimension_numbers<[1], [0], [0], [1], [0, 0, 1, 1], [], []>} : vector<8x128xbf16>, vector<128x64xbf16>, vector<8x64xf32> -> vector<8x64xf32>
    %17 = arith.addf %9, %16 : vector<8x64xf32>
    %c2 = arith.constant 2 : index
    %c0_16 = arith.constant 0 : index
    %c0_17 = arith.constant 0 : index
    %18 = vector.load %arg2[%c2, %c0_16, %c0_17] : memref<3x8x16xbf16, #tpu.memory_space<vmem>>, vector<1x8x16xbf16>
    %19 = vector.shape_cast %18 : vector<1x8x16xbf16> to vector<8x16xbf16>
    %cst_18 = arith.constant dense<0.000000e+00> : vector<8x128xf32>
    %20 = tpu.matmul %19, %2, %cst_18 {dimension_numbers = #tpu.dot_dimension_numbers<[1], [0], [0], [1], [0, 0, 1, 1], [], []>} : vector<8x16xbf16>, vector<16x128xbf16>, vector<8x128xf32> -> vector<8x128xf32>
    %21 = arith.truncf %20 : vector<8x128xf32> to vector<8x128xbf16>
    %c2_19 = arith.constant 2 : index
    %c0_20 = arith.constant 0 : index
    %c0_21 = arith.constant 0 : index
    %22 = vector.load %arg3[%c2_19, %c0_20, %c0_21] : memref<3x128x64xbf16, #tpu.memory_space<vmem>>, vector<1x128x64xbf16>
    %23 = vector.shape_cast %22 : vector<1x128x64xbf16> to vector<128x64xbf16>
    %cst_22 = arith.constant dense<0.000000e+00> : vector<8x64xf32>
    %24 = tpu.matmul %21, %23, %cst_22 {dimension_numbers = #tpu.dot_dimension_numbers<[1], [0], [0], [1], [0, 0, 1, 1], [], []>} : vector<8x128xbf16>, vector<128x64xbf16>, vector<8x64xf32> -> vector<8x64xf32>
    %25 = arith.addf %17, %24 : vector<8x64xf32>
    %c0_23 = arith.constant 0 : index
    %c0_24 = arith.constant 0 : index
    %26 = vector.load %arg4[%c0_23, %c0_24] : memref<1x64xf32, #tpu.memory_space<vmem>>, vector<1x64xf32>
    %27 = vector.broadcast %26 : vector<1x64xf32> to vector<8x64xf32>
    %28 = arith.addf %25, %27 : vector<8x64xf32>
    %cst_25 = arith.constant 0.000000e+00 : f32
    %29 = vector.broadcast %cst_25 : f32 to vector<8x64xf32>
    %30 = arith.cmpf oge, %28, %29 : vector<8x64xf32>
    %cst_26 = arith.constant 2.000000e-01 : f32
    %31 = vector.broadcast %cst_26 : f32 to vector<8x64xf32>
    %32 = arith.mulf %31, %28 : vector<8x64xf32>
    %33 = arith.select %30, %28, %32 : vector<8x64xi1>, vector<8x64xf32>
    %34 = arith.truncf %33 : vector<8x64xf32> to vector<8x64xbf16>
    %c0_27 = arith.constant 0 : index
    %c0_28 = arith.constant 0 : index
    %c0_29 = arith.constant 0 : index
    %35 = vector.load %arg5[%c0_27, %c0_28, %c0_29] : memref<3x4x8xbf16, #tpu.memory_space<vmem>>, vector<1x4x8xbf16>
    %36 = vector.shape_cast %35 : vector<1x4x8xbf16> to vector<4x8xbf16>
    %cst_30 = arith.constant dense<0.000000e+00> : vector<4x64xf32>
    %37 = tpu.matmul %36, %34, %cst_30 {dimension_numbers = #tpu.dot_dimension_numbers<[1], [0], [0], [1], [0, 0, 1, 1], [], []>} : vector<4x8xbf16>, vector<8x64xbf16>, vector<4x64xf32> -> vector<4x64xf32>
    %38 = arith.truncf %37 : vector<4x64xf32> to vector<4x64xbf16>
    %c0_31 = arith.constant 0 : index
    %c0_32 = arith.constant 0 : index
    %c0_33 = arith.constant 0 : index
    %39 = vector.load %arg6[%c0_31, %c0_32, %c0_33] : memref<3x64x32xbf16, #tpu.memory_space<vmem>>, vector<1x64x32xbf16>
    %40 = vector.shape_cast %39 : vector<1x64x32xbf16> to vector<64x32xbf16>
    %cst_34 = arith.constant dense<0.000000e+00> : vector<4x32xf32>
    %41 = tpu.matmul %38, %40, %cst_34 {dimension_numbers = #tpu.dot_dimension_numbers<[1], [0], [0], [1], [0, 0, 1, 1], [], []>} : vector<4x64xbf16>, vector<64x32xbf16>, vector<4x32xf32> -> vector<4x32xf32>
    %c1_35 = arith.constant 1 : index
    %c0_36 = arith.constant 0 : index
    %c0_37 = arith.constant 0 : index
    %42 = vector.load %arg5[%c1_35, %c0_36, %c0_37] : memref<3x4x8xbf16, #tpu.memory_space<vmem>>, vector<1x4x8xbf16>
    %43 = vector.shape_cast %42 : vector<1x4x8xbf16> to vector<4x8xbf16>
    %cst_38 = arith.constant dense<0.000000e+00> : vector<4x64xf32>
    %44 = tpu.matmul %43, %34, %cst_38 {dimension_numbers = #tpu.dot_dimension_numbers<[1], [0], [0], [1], [0, 0, 1, 1], [], []>} : vector<4x8xbf16>, vector<8x64xbf16>, vector<4x64xf32> -> vector<4x64xf32>
    %45 = arith.truncf %44 : vector<4x64xf32> to vector<4x64xbf16>
    %c1_39 = arith.constant 1 : index
    %c0_40 = arith.constant 0 : index
    %c0_41 = arith.constant 0 : index
    %46 = vector.load %arg6[%c1_39, %c0_40, %c0_41] : memref<3x64x32xbf16, #tpu.memory_space<vmem>>, vector<1x64x32xbf16>
    %47 = vector.shape_cast %46 : vector<1x64x32xbf16> to vector<64x32xbf16>
    %cst_42 = arith.constant dense<0.000000e+00> : vector<4x32xf32>
    %48 = tpu.matmul %45, %47, %cst_42 {dimension_numbers = #tpu.dot_dimension_numbers<[1], [0], [0], [1], [0, 0, 1, 1], [], []>} : vector<4x64xbf16>, vector<64x32xbf16>, vector<4x32xf32> -> vector<4x32xf32>
    %49 = arith.addf %41, %48 : vector<4x32xf32>
    %c2_43 = arith.constant 2 : index
    %c0_44 = arith.constant 0 : index
    %c0_45 = arith.constant 0 : index
    %50 = vector.load %arg5[%c2_43, %c0_44, %c0_45] : memref<3x4x8xbf16, #tpu.memory_space<vmem>>, vector<1x4x8xbf16>
    %51 = vector.shape_cast %50 : vector<1x4x8xbf16> to vector<4x8xbf16>
    %cst_46 = arith.constant dense<0.000000e+00> : vector<4x64xf32>
    %52 = tpu.matmul %51, %34, %cst_46 {dimension_numbers = #tpu.dot_dimension_numbers<[1], [0], [0], [1], [0, 0, 1, 1], [], []>} : vector<4x8xbf16>, vector<8x64xbf16>, vector<4x64xf32> -> vector<4x64xf32>
    %53 = arith.truncf %52 : vector<4x64xf32> to vector<4x64xbf16>
    %c2_47 = arith.constant 2 : index
    %c0_48 = arith.constant 0 : index
    %c0_49 = arith.constant 0 : index
    %54 = vector.load %arg6[%c2_47, %c0_48, %c0_49] : memref<3x64x32xbf16, #tpu.memory_space<vmem>>, vector<1x64x32xbf16>
    %55 = vector.shape_cast %54 : vector<1x64x32xbf16> to vector<64x32xbf16>
    %cst_50 = arith.constant dense<0.000000e+00> : vector<4x32xf32>
    %56 = tpu.matmul %53, %55, %cst_50 {dimension_numbers = #tpu.dot_dimension_numbers<[1], [0], [0], [1], [0, 0, 1, 1], [], []>} : vector<4x64xbf16>, vector<64x32xbf16>, vector<4x32xf32> -> vector<4x32xf32>
    %57 = arith.addf %49, %56 : vector<4x32xf32>
    %c0_51 = arith.constant 0 : index
    %c0_52 = arith.constant 0 : index
    %58 = vector.load %arg7[%c0_51, %c0_52] : memref<1x32xf32, #tpu.memory_space<vmem>>, vector<1x32xf32>
    %59 = vector.broadcast %58 : vector<1x32xf32> to vector<4x32xf32>
    %60 = arith.addf %57, %59 : vector<4x32xf32>
    %cst_53 = arith.constant 0.000000e+00 : f32
    %61 = vector.broadcast %cst_53 : f32 to vector<4x32xf32>
    %62 = arith.cmpf oge, %60, %61 : vector<4x32xf32>
    %cst_54 = arith.constant 2.000000e-01 : f32
    %63 = vector.broadcast %cst_54 : f32 to vector<4x32xf32>
    %64 = arith.mulf %63, %60 : vector<4x32xf32>
    %65 = arith.select %62, %60, %64 : vector<4x32xi1>, vector<4x32xf32>
    %66 = arith.truncf %65 : vector<4x32xf32> to vector<4x32xbf16>
    %c0_55 = arith.constant 0 : index
    %c0_56 = arith.constant 0 : index
    %c0_57 = arith.constant 0 : index
    %67 = vector.load %arg8[%c0_55, %c0_56, %c0_57] : memref<3x2x4xbf16, #tpu.memory_space<vmem>>, vector<1x2x4xbf16>
    %68 = vector.shape_cast %67 : vector<1x2x4xbf16> to vector<2x4xbf16>
    %cst_58 = arith.constant dense<0.000000e+00> : vector<2x32xf32>
    %69 = tpu.matmul %68, %66, %cst_58 {dimension_numbers = #tpu.dot_dimension_numbers<[1], [0], [0], [1], [0, 0, 1, 1], [], []>} : vector<2x4xbf16>, vector<4x32xbf16>, vector<2x32xf32> -> vector<2x32xf32>
    %70 = arith.truncf %69 : vector<2x32xf32> to vector<2x32xbf16>
    %c0_59 = arith.constant 0 : index
    %c0_60 = arith.constant 0 : index
    %c0_61 = arith.constant 0 : index
    %71 = vector.load %arg9[%c0_59, %c0_60, %c0_61] : memref<3x32x16xbf16, #tpu.memory_space<vmem>>, vector<1x32x16xbf16>
    %72 = vector.shape_cast %71 : vector<1x32x16xbf16> to vector<32x16xbf16>
    %cst_62 = arith.constant dense<0.000000e+00> : vector<2x16xf32>
    %73 = tpu.matmul %70, %72, %cst_62 {dimension_numbers = #tpu.dot_dimension_numbers<[1], [0], [0], [1], [0, 0, 1, 1], [], []>} : vector<2x32xbf16>, vector<32x16xbf16>, vector<2x16xf32> -> vector<2x16xf32>
    %c1_63 = arith.constant 1 : index
    %c0_64 = arith.constant 0 : index
    %c0_65 = arith.constant 0 : index
    %74 = vector.load %arg8[%c1_63, %c0_64, %c0_65] : memref<3x2x4xbf16, #tpu.memory_space<vmem>>, vector<1x2x4xbf16>
    %75 = vector.shape_cast %74 : vector<1x2x4xbf16> to vector<2x4xbf16>
    %cst_66 = arith.constant dense<0.000000e+00> : vector<2x32xf32>
    %76 = tpu.matmul %75, %66, %cst_66 {dimension_numbers = #tpu.dot_dimension_numbers<[1], [0], [0], [1], [0, 0, 1, 1], [], []>} : vector<2x4xbf16>, vector<4x32xbf16>, vector<2x32xf32> -> vector<2x32xf32>
    %77 = arith.truncf %76 : vector<2x32xf32> to vector<2x32xbf16>
    %c1_67 = arith.constant 1 : index
    %c0_68 = arith.constant 0 : index
    %c0_69 = arith.constant 0 : index
    %78 = vector.load %arg9[%c1_67, %c0_68, %c0_69] : memref<3x32x16xbf16, #tpu.memory_space<vmem>>, vector<1x32x16xbf16>
    %79 = vector.shape_cast %78 : vector<1x32x16xbf16> to vector<32x16xbf16>
    %cst_70 = arith.constant dense<0.000000e+00> : vector<2x16xf32>
    %80 = tpu.matmul %77, %79, %cst_70 {dimension_numbers = #tpu.dot_dimension_numbers<[1], [0], [0], [1], [0, 0, 1, 1], [], []>} : vector<2x32xbf16>, vector<32x16xbf16>, vector<2x16xf32> -> vector<2x16xf32>
    %81 = arith.addf %73, %80 : vector<2x16xf32>
    %c2_71 = arith.constant 2 : index
    %c0_72 = arith.constant 0 : index
    %c0_73 = arith.constant 0 : index
    %82 = vector.load %arg8[%c2_71, %c0_72, %c0_73] : memref<3x2x4xbf16, #tpu.memory_space<vmem>>, vector<1x2x4xbf16>
    %83 = vector.shape_cast %82 : vector<1x2x4xbf16> to vector<2x4xbf16>
    %cst_74 = arith.constant dense<0.000000e+00> : vector<2x32xf32>
    %84 = tpu.matmul %83, %66, %cst_74 {dimension_numbers = #tpu.dot_dimension_numbers<[1], [0], [0], [1], [0, 0, 1, 1], [], []>} : vector<2x4xbf16>, vector<4x32xbf16>, vector<2x32xf32> -> vector<2x32xf32>
    %85 = arith.truncf %84 : vector<2x32xf32> to vector<2x32xbf16>
    %c2_75 = arith.constant 2 : index
    %c0_76 = arith.constant 0 : index
    %c0_77 = arith.constant 0 : index
    %86 = vector.load %arg9[%c2_75, %c0_76, %c0_77] : memref<3x32x16xbf16, #tpu.memory_space<vmem>>, vector<1x32x16xbf16>
    %87 = vector.shape_cast %86 : vector<1x32x16xbf16> to vector<32x16xbf16>
    %cst_78 = arith.constant dense<0.000000e+00> : vector<2x16xf32>
    %88 = tpu.matmul %85, %87, %cst_78 {dimension_numbers = #tpu.dot_dimension_numbers<[1], [0], [0], [1], [0, 0, 1, 1], [], []>} : vector<2x32xbf16>, vector<32x16xbf16>, vector<2x16xf32> -> vector<2x16xf32>
    %89 = arith.addf %81, %88 : vector<2x16xf32>
    %c0_79 = arith.constant 0 : index
    %c0_80 = arith.constant 0 : index
    %90 = vector.load %arg10[%c0_79, %c0_80] : memref<1x16xf32, #tpu.memory_space<vmem>>, vector<1x16xf32>
    %91 = vector.broadcast %90 : vector<1x16xf32> to vector<2x16xf32>
    %92 = arith.addf %89, %91 : vector<2x16xf32>
    %cst_81 = arith.constant 0.000000e+00 : f32
    %93 = vector.broadcast %cst_81 : f32 to vector<2x16xf32>
    %94 = arith.cmpf oge, %92, %93 : vector<2x16xf32>
    %cst_82 = arith.constant 2.000000e-01 : f32
    %95 = vector.broadcast %cst_82 : f32 to vector<2x16xf32>
    %96 = arith.mulf %95, %92 : vector<2x16xf32>
    %97 = arith.select %94, %92, %96 : vector<2x16xi1>, vector<2x16xf32>
    %98 = arith.truncf %97 : vector<2x16xf32> to vector<2x16xbf16>
    %c0_83 = arith.constant 0 : index
    %c0_84 = arith.constant 0 : index
    %c0_85 = arith.constant 0 : index
    %99 = vector.load %arg11[%c0_83, %c0_84, %c0_85] : memref<3x2x2xbf16, #tpu.memory_space<vmem>>, vector<1x2x2xbf16>
    %100 = vector.shape_cast %99 : vector<1x2x2xbf16> to vector<2x2xbf16>
    %cst_86 = arith.constant dense<0.000000e+00> : vector<2x16xf32>
    %101 = tpu.matmul %100, %98, %cst_86 {dimension_numbers = #tpu.dot_dimension_numbers<[1], [0], [0], [1], [0, 0, 1, 1], [], []>} : vector<2x2xbf16>, vector<2x16xbf16>, vector<2x16xf32> -> vector<2x16xf32>
    %102 = arith.truncf %101 : vector<2x16xf32> to vector<2x16xbf16>
    %c0_87 = arith.constant 0 : index
    %c0_88 = arith.constant 0 : index
    %c0_89 = arith.constant 0 : index
    %103 = vector.load %arg12[%c0_87, %c0_88, %c0_89] : memref<3x16x16xbf16, #tpu.memory_space<vmem>>, vector<1x16x16xbf16>
    %104 = vector.shape_cast %103 : vector<1x16x16xbf16> to vector<16x16xbf16>
    %cst_90 = arith.constant dense<0.000000e+00> : vector<2x16xf32>
    %105 = tpu.matmul %102, %104, %cst_90 {dimension_numbers = #tpu.dot_dimension_numbers<[1], [0], [0], [1], [0, 0, 1, 1], [], []>} : vector<2x16xbf16>, vector<16x16xbf16>, vector<2x16xf32> -> vector<2x16xf32>
    %c1_91 = arith.constant 1 : index
    %c0_92 = arith.constant 0 : index
    %c0_93 = arith.constant 0 : index
    %106 = vector.load %arg11[%c1_91, %c0_92, %c0_93] : memref<3x2x2xbf16, #tpu.memory_space<vmem>>, vector<1x2x2xbf16>
    %107 = vector.shape_cast %106 : vector<1x2x2xbf16> to vector<2x2xbf16>
    %cst_94 = arith.constant dense<0.000000e+00> : vector<2x16xf32>
    %108 = tpu.matmul %107, %98, %cst_94 {dimension_numbers = #tpu.dot_dimension_numbers<[1], [0], [0], [1], [0, 0, 1, 1], [], []>} : vector<2x2xbf16>, vector<2x16xbf16>, vector<2x16xf32> -> vector<2x16xf32>
    %109 = arith.truncf %108 : vector<2x16xf32> to vector<2x16xbf16>
    %c1_95 = arith.constant 1 : index
    %c0_96 = arith.constant 0 : index
    %c0_97 = arith.constant 0 : index
    %110 = vector.load %arg12[%c1_95, %c0_96, %c0_97] : memref<3x16x16xbf16, #tpu.memory_space<vmem>>, vector<1x16x16xbf16>
    %111 = vector.shape_cast %110 : vector<1x16x16xbf16> to vector<16x16xbf16>
    %cst_98 = arith.constant dense<0.000000e+00> : vector<2x16xf32>
    %112 = tpu.matmul %109, %111, %cst_98 {dimension_numbers = #tpu.dot_dimension_numbers<[1], [0], [0], [1], [0, 0, 1, 1], [], []>} : vector<2x16xbf16>, vector<16x16xbf16>, vector<2x16xf32> -> vector<2x16xf32>
    %113 = arith.addf %105, %112 : vector<2x16xf32>
    %c2_99 = arith.constant 2 : index
    %c0_100 = arith.constant 0 : index
    %c0_101 = arith.constant 0 : index
    %114 = vector.load %arg11[%c2_99, %c0_100, %c0_101] : memref<3x2x2xbf16, #tpu.memory_space<vmem>>, vector<1x2x2xbf16>
    %115 = vector.shape_cast %114 : vector<1x2x2xbf16> to vector<2x2xbf16>
    %cst_102 = arith.constant dense<0.000000e+00> : vector<2x16xf32>
    %116 = tpu.matmul %115, %98, %cst_102 {dimension_numbers = #tpu.dot_dimension_numbers<[1], [0], [0], [1], [0, 0, 1, 1], [], []>} : vector<2x2xbf16>, vector<2x16xbf16>, vector<2x16xf32> -> vector<2x16xf32>
    %117 = arith.truncf %116 : vector<2x16xf32> to vector<2x16xbf16>
    %c2_103 = arith.constant 2 : index
    %c0_104 = arith.constant 0 : index
    %c0_105 = arith.constant 0 : index
    %118 = vector.load %arg12[%c2_103, %c0_104, %c0_105] : memref<3x16x16xbf16, #tpu.memory_space<vmem>>, vector<1x16x16xbf16>
    %119 = vector.shape_cast %118 : vector<1x16x16xbf16> to vector<16x16xbf16>
    %cst_106 = arith.constant dense<0.000000e+00> : vector<2x16xf32>
    %120 = tpu.matmul %117, %119, %cst_106 {dimension_numbers = #tpu.dot_dimension_numbers<[1], [0], [0], [1], [0, 0, 1, 1], [], []>} : vector<2x16xbf16>, vector<16x16xbf16>, vector<2x16xf32> -> vector<2x16xf32>
    %121 = arith.addf %113, %120 : vector<2x16xf32>
    %c0_107 = arith.constant 0 : index
    %c0_108 = arith.constant 0 : index
    %122 = vector.load %arg13[%c0_107, %c0_108] : memref<1x16xf32, #tpu.memory_space<vmem>>, vector<1x16xf32>
    %123 = vector.broadcast %122 : vector<1x16xf32> to vector<2x16xf32>
    %124 = arith.addf %121, %123 : vector<2x16xf32>
    %cst_109 = arith.constant 0.000000e+00 : f32
    %125 = vector.broadcast %cst_109 : f32 to vector<2x16xf32>
    %126 = arith.cmpf oge, %124, %125 : vector<2x16xf32>
    %cst_110 = arith.constant 2.000000e-01 : f32
    %127 = vector.broadcast %cst_110 : f32 to vector<2x16xf32>
    %128 = arith.mulf %127, %124 : vector<2x16xf32>
    %129 = arith.select %126, %124, %128 : vector<2x16xi1>, vector<2x16xf32>
    %130 = arith.addf %129, %97 : vector<2x16xf32>
    %131 = arith.truncf %130 : vector<2x16xf32> to vector<2x16xbf16>
    %c0_111 = arith.constant 0 : index
    %c0_112 = arith.constant 0 : index
    %c0_113 = arith.constant 0 : index
    %132 = vector.load %arg14[%c0_111, %c0_112, %c0_113] : memref<3x4x2xbf16, #tpu.memory_space<vmem>>, vector<1x4x2xbf16>
    %133 = vector.shape_cast %132 : vector<1x4x2xbf16> to vector<4x2xbf16>
    %cst_114 = arith.constant dense<0.000000e+00> : vector<4x16xf32>
    %134 = tpu.matmul %133, %131, %cst_114 {dimension_numbers = #tpu.dot_dimension_numbers<[1], [0], [0], [1], [0, 0, 1, 1], [], []>} : vector<4x2xbf16>, vector<2x16xbf16>, vector<4x16xf32> -> vector<4x16xf32>
    %135 = arith.truncf %134 : vector<4x16xf32> to vector<4x16xbf16>
    %c0_115 = arith.constant 0 : index
    %c0_116 = arith.constant 0 : index
    %c0_117 = arith.constant 0 : index
    %136 = vector.load %arg15[%c0_115, %c0_116, %c0_117] : memref<3x16x32xbf16, #tpu.memory_space<vmem>>, vector<1x16x32xbf16>
    %137 = vector.shape_cast %136 : vector<1x16x32xbf16> to vector<16x32xbf16>
    %cst_118 = arith.constant dense<0.000000e+00> : vector<4x32xf32>
    %138 = tpu.matmul %135, %137, %cst_118 {dimension_numbers = #tpu.dot_dimension_numbers<[1], [0], [0], [1], [0, 0, 1, 1], [], []>} : vector<4x16xbf16>, vector<16x32xbf16>, vector<4x32xf32> -> vector<4x32xf32>
    %c1_119 = arith.constant 1 : index
    %c0_120 = arith.constant 0 : index
    %c0_121 = arith.constant 0 : index
    %139 = vector.load %arg14[%c1_119, %c0_120, %c0_121] : memref<3x4x2xbf16, #tpu.memory_space<vmem>>, vector<1x4x2xbf16>
    %140 = vector.shape_cast %139 : vector<1x4x2xbf16> to vector<4x2xbf16>
    %cst_122 = arith.constant dense<0.000000e+00> : vector<4x16xf32>
    %141 = tpu.matmul %140, %131, %cst_122 {dimension_numbers = #tpu.dot_dimension_numbers<[1], [0], [0], [1], [0, 0, 1, 1], [], []>} : vector<4x2xbf16>, vector<2x16xbf16>, vector<4x16xf32> -> vector<4x16xf32>
    %142 = arith.truncf %141 : vector<4x16xf32> to vector<4x16xbf16>
    %c1_123 = arith.constant 1 : index
    %c0_124 = arith.constant 0 : index
    %c0_125 = arith.constant 0 : index
    %143 = vector.load %arg15[%c1_123, %c0_124, %c0_125] : memref<3x16x32xbf16, #tpu.memory_space<vmem>>, vector<1x16x32xbf16>
    %144 = vector.shape_cast %143 : vector<1x16x32xbf16> to vector<16x32xbf16>
    %cst_126 = arith.constant dense<0.000000e+00> : vector<4x32xf32>
    %145 = tpu.matmul %142, %144, %cst_126 {dimension_numbers = #tpu.dot_dimension_numbers<[1], [0], [0], [1], [0, 0, 1, 1], [], []>} : vector<4x16xbf16>, vector<16x32xbf16>, vector<4x32xf32> -> vector<4x32xf32>
    %146 = arith.addf %138, %145 : vector<4x32xf32>
    %c2_127 = arith.constant 2 : index
    %c0_128 = arith.constant 0 : index
    %c0_129 = arith.constant 0 : index
    %147 = vector.load %arg14[%c2_127, %c0_128, %c0_129] : memref<3x4x2xbf16, #tpu.memory_space<vmem>>, vector<1x4x2xbf16>
    %148 = vector.shape_cast %147 : vector<1x4x2xbf16> to vector<4x2xbf16>
    %cst_130 = arith.constant dense<0.000000e+00> : vector<4x16xf32>
    %149 = tpu.matmul %148, %131, %cst_130 {dimension_numbers = #tpu.dot_dimension_numbers<[1], [0], [0], [1], [0, 0, 1, 1], [], []>} : vector<4x2xbf16>, vector<2x16xbf16>, vector<4x16xf32> -> vector<4x16xf32>
    %150 = arith.truncf %149 : vector<4x16xf32> to vector<4x16xbf16>
    %c2_131 = arith.constant 2 : index
    %c0_132 = arith.constant 0 : index
    %c0_133 = arith.constant 0 : index
    %151 = vector.load %arg15[%c2_131, %c0_132, %c0_133] : memref<3x16x32xbf16, #tpu.memory_space<vmem>>, vector<1x16x32xbf16>
    %152 = vector.shape_cast %151 : vector<1x16x32xbf16> to vector<16x32xbf16>
    %cst_134 = arith.constant dense<0.000000e+00> : vector<4x32xf32>
    %153 = tpu.matmul %150, %152, %cst_134 {dimension_numbers = #tpu.dot_dimension_numbers<[1], [0], [0], [1], [0, 0, 1, 1], [], []>} : vector<4x16xbf16>, vector<16x32xbf16>, vector<4x32xf32> -> vector<4x32xf32>
    %154 = arith.addf %146, %153 : vector<4x32xf32>
    %c0_135 = arith.constant 0 : index
    %c0_136 = arith.constant 0 : index
    %155 = vector.load %arg16[%c0_135, %c0_136] : memref<1x32xf32, #tpu.memory_space<vmem>>, vector<1x32xf32>
    %156 = vector.broadcast %155 : vector<1x32xf32> to vector<4x32xf32>
    %157 = arith.addf %154, %156 : vector<4x32xf32>
    %cst_137 = arith.constant 0.000000e+00 : f32
    %158 = vector.broadcast %cst_137 : f32 to vector<4x32xf32>
    %159 = arith.cmpf oge, %157, %158 : vector<4x32xf32>
    %cst_138 = arith.constant 2.000000e-01 : f32
    %160 = vector.broadcast %cst_138 : f32 to vector<4x32xf32>
    %161 = arith.mulf %160, %157 : vector<4x32xf32>
    %162 = arith.select %159, %157, %161 : vector<4x32xi1>, vector<4x32xf32>
    %163 = arith.addf %162, %65 : vector<4x32xf32>
    %164 = arith.truncf %163 : vector<4x32xf32> to vector<4x32xbf16>
    %c0_139 = arith.constant 0 : index
    %c0_140 = arith.constant 0 : index
    %c0_141 = arith.constant 0 : index
    %165 = vector.load %arg17[%c0_139, %c0_140, %c0_141] : memref<3x8x4xbf16, #tpu.memory_space<vmem>>, vector<1x8x4xbf16>
    %166 = vector.shape_cast %165 : vector<1x8x4xbf16> to vector<8x4xbf16>
    %cst_142 = arith.constant dense<0.000000e+00> : vector<8x32xf32>
    %167 = tpu.matmul %166, %164, %cst_142 {dimension_numbers = #tpu.dot_dimension_numbers<[1], [0], [0], [1], [0, 0, 1, 1], [], []>} : vector<8x4xbf16>, vector<4x32xbf16>, vector<8x32xf32> -> vector<8x32xf32>
    %168 = arith.truncf %167 : vector<8x32xf32> to vector<8x32xbf16>
    %c0_143 = arith.constant 0 : index
    %c0_144 = arith.constant 0 : index
    %c0_145 = arith.constant 0 : index
    %169 = vector.load %arg18[%c0_143, %c0_144, %c0_145] : memref<3x32x64xbf16, #tpu.memory_space<vmem>>, vector<1x32x64xbf16>
    %170 = vector.shape_cast %169 : vector<1x32x64xbf16> to vector<32x64xbf16>
    %cst_146 = arith.constant dense<0.000000e+00> : vector<8x64xf32>
    %171 = tpu.matmul %168, %170, %cst_146 {dimension_numbers = #tpu.dot_dimension_numbers<[1], [0], [0], [1], [0, 0, 1, 1], [], []>} : vector<8x32xbf16>, vector<32x64xbf16>, vector<8x64xf32> -> vector<8x64xf32>
    %c1_147 = arith.constant 1 : index
    %c0_148 = arith.constant 0 : index
    %c0_149 = arith.constant 0 : index
    %172 = vector.load %arg17[%c1_147, %c0_148, %c0_149] : memref<3x8x4xbf16, #tpu.memory_space<vmem>>, vector<1x8x4xbf16>
    %173 = vector.shape_cast %172 : vector<1x8x4xbf16> to vector<8x4xbf16>
    %cst_150 = arith.constant dense<0.000000e+00> : vector<8x32xf32>
    %174 = tpu.matmul %173, %164, %cst_150 {dimension_numbers = #tpu.dot_dimension_numbers<[1], [0], [0], [1], [0, 0, 1, 1], [], []>} : vector<8x4xbf16>, vector<4x32xbf16>, vector<8x32xf32> -> vector<8x32xf32>
    %175 = arith.truncf %174 : vector<8x32xf32> to vector<8x32xbf16>
    %c1_151 = arith.constant 1 : index
    %c0_152 = arith.constant 0 : index
    %c0_153 = arith.constant 0 : index
    %176 = vector.load %arg18[%c1_151, %c0_152, %c0_153] : memref<3x32x64xbf16, #tpu.memory_space<vmem>>, vector<1x32x64xbf16>
    %177 = vector.shape_cast %176 : vector<1x32x64xbf16> to vector<32x64xbf16>
    %cst_154 = arith.constant dense<0.000000e+00> : vector<8x64xf32>
    %178 = tpu.matmul %175, %177, %cst_154 {dimension_numbers = #tpu.dot_dimension_numbers<[1], [0], [0], [1], [0, 0, 1, 1], [], []>} : vector<8x32xbf16>, vector<32x64xbf16>, vector<8x64xf32> -> vector<8x64xf32>
    %179 = arith.addf %171, %178 : vector<8x64xf32>
    %c2_155 = arith.constant 2 : index
    %c0_156 = arith.constant 0 : index
    %c0_157 = arith.constant 0 : index
    %180 = vector.load %arg17[%c2_155, %c0_156, %c0_157] : memref<3x8x4xbf16, #tpu.memory_space<vmem>>, vector<1x8x4xbf16>
    %181 = vector.shape_cast %180 : vector<1x8x4xbf16> to vector<8x4xbf16>
    %cst_158 = arith.constant dense<0.000000e+00> : vector<8x32xf32>
    %182 = tpu.matmul %181, %164, %cst_158 {dimension_numbers = #tpu.dot_dimension_numbers<[1], [0], [0], [1], [0, 0, 1, 1], [], []>} : vector<8x4xbf16>, vector<4x32xbf16>, vector<8x32xf32> -> vector<8x32xf32>
    %183 = arith.truncf %182 : vector<8x32xf32> to vector<8x32xbf16>
    %c2_159 = arith.constant 2 : index
    %c0_160 = arith.constant 0 : index
    %c0_161 = arith.constant 0 : index
    %184 = vector.load %arg18[%c2_159, %c0_160, %c0_161] : memref<3x32x64xbf16, #tpu.memory_space<vmem>>, vector<1x32x64xbf16>
    %185 = vector.shape_cast %184 : vector<1x32x64xbf16> to vector<32x64xbf16>
    %cst_162 = arith.constant dense<0.000000e+00> : vector<8x64xf32>
    %186 = tpu.matmul %183, %185, %cst_162 {dimension_numbers = #tpu.dot_dimension_numbers<[1], [0], [0], [1], [0, 0, 1, 1], [], []>} : vector<8x32xbf16>, vector<32x64xbf16>, vector<8x64xf32> -> vector<8x64xf32>
    %187 = arith.addf %179, %186 : vector<8x64xf32>
    %c0_163 = arith.constant 0 : index
    %c0_164 = arith.constant 0 : index
    %188 = vector.load %arg19[%c0_163, %c0_164] : memref<1x64xf32, #tpu.memory_space<vmem>>, vector<1x64xf32>
    %189 = vector.broadcast %188 : vector<1x64xf32> to vector<8x64xf32>
    %190 = arith.addf %187, %189 : vector<8x64xf32>
    %cst_165 = arith.constant 0.000000e+00 : f32
    %191 = vector.broadcast %cst_165 : f32 to vector<8x64xf32>
    %192 = arith.cmpf oge, %190, %191 : vector<8x64xf32>
    %cst_166 = arith.constant 2.000000e-01 : f32
    %193 = vector.broadcast %cst_166 : f32 to vector<8x64xf32>
    %194 = arith.mulf %193, %190 : vector<8x64xf32>
    %195 = arith.select %192, %190, %194 : vector<8x64xi1>, vector<8x64xf32>
    %196 = arith.addf %195, %33 : vector<8x64xf32>
    %197 = arith.truncf %196 : vector<8x64xf32> to vector<8x64xbf16>
    %c0_167 = arith.constant 0 : index
    %c0_168 = arith.constant 0 : index
    %c0_169 = arith.constant 0 : index
    %198 = vector.load %arg20[%c0_167, %c0_168, %c0_169] : memref<3x16x8xbf16, #tpu.memory_space<vmem>>, vector<1x16x8xbf16>
    %199 = vector.shape_cast %198 : vector<1x16x8xbf16> to vector<16x8xbf16>
    %cst_170 = arith.constant dense<0.000000e+00> : vector<16x64xf32>
    %200 = tpu.matmul %199, %197, %cst_170 {dimension_numbers = #tpu.dot_dimension_numbers<[1], [0], [0], [1], [0, 0, 1, 1], [], []>} : vector<16x8xbf16>, vector<8x64xbf16>, vector<16x64xf32> -> vector<16x64xf32>
    %201 = arith.truncf %200 : vector<16x64xf32> to vector<16x64xbf16>
    %c0_171 = arith.constant 0 : index
    %c0_172 = arith.constant 0 : index
    %c0_173 = arith.constant 0 : index
    %202 = vector.load %arg21[%c0_171, %c0_172, %c0_173] : memref<3x64x128xbf16, #tpu.memory_space<vmem>>, vector<1x64x128xbf16>
    %203 = vector.shape_cast %202 : vector<1x64x128xbf16> to vector<64x128xbf16>
    %cst_174 = arith.constant dense<0.000000e+00> : vector<16x128xf32>
    %204 = tpu.matmul %201, %203, %cst_174 {dimension_numbers = #tpu.dot_dimension_numbers<[1], [0], [0], [1], [0, 0, 1, 1], [], []>} : vector<16x64xbf16>, vector<64x128xbf16>, vector<16x128xf32> -> vector<16x128xf32>
    %c1_175 = arith.constant 1 : index
    %c0_176 = arith.constant 0 : index
    %c0_177 = arith.constant 0 : index
    %205 = vector.load %arg20[%c1_175, %c0_176, %c0_177] : memref<3x16x8xbf16, #tpu.memory_space<vmem>>, vector<1x16x8xbf16>
    %206 = vector.shape_cast %205 : vector<1x16x8xbf16> to vector<16x8xbf16>
    %cst_178 = arith.constant dense<0.000000e+00> : vector<16x64xf32>
    %207 = tpu.matmul %206, %197, %cst_178 {dimension_numbers = #tpu.dot_dimension_numbers<[1], [0], [0], [1], [0, 0, 1, 1], [], []>} : vector<16x8xbf16>, vector<8x64xbf16>, vector<16x64xf32> -> vector<16x64xf32>
    %208 = arith.truncf %207 : vector<16x64xf32> to vector<16x64xbf16>
    %c1_179 = arith.constant 1 : index
    %c0_180 = arith.constant 0 : index
    %c0_181 = arith.constant 0 : index
    %209 = vector.load %arg21[%c1_179, %c0_180, %c0_181] : memref<3x64x128xbf16, #tpu.memory_space<vmem>>, vector<1x64x128xbf16>
    %210 = vector.shape_cast %209 : vector<1x64x128xbf16> to vector<64x128xbf16>
    %cst_182 = arith.constant dense<0.000000e+00> : vector<16x128xf32>
    %211 = tpu.matmul %208, %210, %cst_182 {dimension_numbers = #tpu.dot_dimension_numbers<[1], [0], [0], [1], [0, 0, 1, 1], [], []>} : vector<16x64xbf16>, vector<64x128xbf16>, vector<16x128xf32> -> vector<16x128xf32>
    %212 = arith.addf %204, %211 : vector<16x128xf32>
    %c2_183 = arith.constant 2 : index
    %c0_184 = arith.constant 0 : index
    %c0_185 = arith.constant 0 : index
    %213 = vector.load %arg20[%c2_183, %c0_184, %c0_185] : memref<3x16x8xbf16, #tpu.memory_space<vmem>>, vector<1x16x8xbf16>
    %214 = vector.shape_cast %213 : vector<1x16x8xbf16> to vector<16x8xbf16>
    %cst_186 = arith.constant dense<0.000000e+00> : vector<16x64xf32>
    %215 = tpu.matmul %214, %197, %cst_186 {dimension_numbers = #tpu.dot_dimension_numbers<[1], [0], [0], [1], [0, 0, 1, 1], [], []>} : vector<16x8xbf16>, vector<8x64xbf16>, vector<16x64xf32> -> vector<16x64xf32>
    %216 = arith.truncf %215 : vector<16x64xf32> to vector<16x64xbf16>
    %c2_187 = arith.constant 2 : index
    %c0_188 = arith.constant 0 : index
    %c0_189 = arith.constant 0 : index
    %217 = vector.load %arg21[%c2_187, %c0_188, %c0_189] : memref<3x64x128xbf16, #tpu.memory_space<vmem>>, vector<1x64x128xbf16>
    %218 = vector.shape_cast %217 : vector<1x64x128xbf16> to vector<64x128xbf16>
    %cst_190 = arith.constant dense<0.000000e+00> : vector<16x128xf32>
    %219 = tpu.matmul %216, %218, %cst_190 {dimension_numbers = #tpu.dot_dimension_numbers<[1], [0], [0], [1], [0, 0, 1, 1], [], []>} : vector<16x64xbf16>, vector<64x128xbf16>, vector<16x128xf32> -> vector<16x128xf32>
    %220 = arith.addf %212, %219 : vector<16x128xf32>
    %c0_191 = arith.constant 0 : index
    %c0_192 = arith.constant 0 : index
    %221 = vector.load %arg22[%c0_191, %c0_192] : memref<1x128xf32, #tpu.memory_space<vmem>>, vector<1x128xf32>
    %222 = vector.broadcast %221 : vector<1x128xf32> to vector<16x128xf32>
    %223 = arith.addf %220, %222 : vector<16x128xf32>
    %cst_193 = arith.constant 0.000000e+00 : f32
    %224 = vector.broadcast %cst_193 : f32 to vector<16x128xf32>
    %225 = arith.cmpf oge, %223, %224 : vector<16x128xf32>
    %cst_194 = arith.constant 2.000000e-01 : f32
    %226 = vector.broadcast %cst_194 : f32 to vector<16x128xf32>
    %227 = arith.mulf %226, %223 : vector<16x128xf32>
    %228 = arith.select %225, %223, %227 : vector<16x128xi1>, vector<16x128xf32>
    %229 = arith.addf %228, %1 : vector<16x128xf32>
    %c0_195 = arith.constant 0 : index
    %c0_196 = arith.constant 0 : index
    %c0_197 = arith.constant 0 : index
    %230 = vector.load %arg23[%c0_195, %c0_196, %c0_197] : memref<1x16x128xf32, #tpu.memory_space<vmem>>, vector<1x16x128xf32>
    %231 = vector.shape_cast %230 : vector<1x16x128xf32> to vector<16x128xf32>
    %232 = vector.shape_cast %229 : vector<16x128xf32> to vector<1x16x128xf32>
    tpu.vector_store %arg23[%c0_195, %c0_196, %c0_197], %232 {strides = array<i32>} : memref<1x16x128xf32, #tpu.memory_space<vmem>>, vector<1x16x128xf32>,
    return
  }
  func.func @transform_0(%arg0: i32) -> (i32, i32, i32) {
    %c0_i32 = arith.constant 0 : i32
    %c0_i32_0 = arith.constant 0 : i32
    %c0_i32_1 = arith.constant 0 : i32
    return %arg0, %c0_i32, %c0_i32_0 : i32, i32, i32
  }
  func.func @transform_1(%arg0: i32) -> (i32, i32, i32) {
    %c0_i32 = arith.constant 0 : i32
    %c0_i32_0 = arith.constant 0 : i32
    %c0_i32_1 = arith.constant 0 : i32
    %c0_i32_2 = arith.constant 0 : i32
    return %c0_i32, %c0_i32_0, %c0_i32_1 : i32, i32, i32
  }
  func.func @transform_2(%arg0: i32) -> (i32, i32, i32) {
    %c0_i32 = arith.constant 0 : i32
    %c0_i32_0 = arith.constant 0 : i32
    %c0_i32_1 = arith.constant 0 : i32
    %c0_i32_2 = arith.constant 0 : i32
    return %c0_i32, %c0_i32_0, %c0_i32_1 : i32, i32, i32
  }
  func.func @transform_3(%arg0: i32) -> (i32, i32) {
    %c0_i32 = arith.constant 0 : i32
    %c0_i32_0 = arith.constant 0 : i32
    %c0_i32_1 = arith.constant 0 : i32
    return %c0_i32, %c0_i32_0 : i32, i32
  }
  func.func @transform_4(%arg0: i32) -> (i32, i32, i32) {
    %c0_i32 = arith.constant 0 : i32
    %c0_i32_0 = arith.constant 0 : i32
    %c0_i32_1 = arith.constant 0 : i32
    %c0_i32_2 = arith.constant 0 : i32
    return %c0_i32, %c0_i32_0, %c0_i32_1 : i32, i32, i32
  }
  func.func @transform_5(%arg0: i32) -> (i32, i32, i32) {
    %c0_i32 = arith.constant 0 : i32
    %c0_i32_0 = arith.constant 0 : i32
    %c0_i32_1 = arith.constant 0 : i32
    %c0_i32_2 = arith.constant 0 : i32
    return %c0_i32, %c0_i32_0, %c0_i32_1 : i32, i32, i32
  }
  func.func @transform_6(%arg0: i32) -> (i32, i32) {
    %c0_i32 = arith.constant 0 : i32
    %c0_i32_0 = arith.constant 0 : i32
    %c0_i32_1 = arith.constant 0 : i32
    return %c0_i32, %c0_i32_0 : i32, i32
  }
  func.func @transform_7(%arg0: i32) -> (i32, i32, i32) {
    %c0_i32 = arith.constant 0 : i32
    %c0_i32_0 = arith.constant 0 : i32
    %c0_i32_1 = arith.constant 0 : i32
    %c0_i32_2 = arith.constant 0 : i32
    return %c0_i32, %c0_i32_0, %c0_i32_1 : i32, i32, i32
  }
  func.func @transform_8(%arg0: i32) -> (i32, i32, i32) {
    %c0_i32 = arith.constant 0 : i32
    %c0_i32_0 = arith.constant 0 : i32
    %c0_i32_1 = arith.constant 0 : i32
    %c0_i32_2 = arith.constant 0 : i32
    return %c0_i32, %c0_i32_0, %c0_i32_1 : i32, i32, i32
  }
  func.func @transform_9(%arg0: i32) -> (i32, i32) {
    %c0_i32 = arith.constant 0 : i32
    %c0_i32_0 = arith.constant 0 : i32
    %c0_i32_1 = arith.constant 0 : i32
    return %c0_i32, %c0_i32_0 : i32, i32
  }
  func.func @transform_10(%arg0: i32) -> (i32, i32, i32) {
    %c0_i32 = arith.constant 0 : i32
    %c0_i32_0 = arith.constant 0 : i32
    %c0_i32_1 = arith.constant 0 : i32
    %c0_i32_2 = arith.constant 0 : i32
    return %c0_i32, %c0_i32_0, %c0_i32_1 : i32, i32, i32
  }
  func.func @transform_11(%arg0: i32) -> (i32, i32, i32) {
    %c0_i32 = arith.constant 0 : i32
    %c0_i32_0 = arith.constant 0 : i32
    %c0_i32_1 = arith.constant 0 : i32
    %c0_i32_2 = arith.constant 0 : i32
    return %c0_i32, %c0_i32_0, %c0_i32_1 : i32, i32, i32
  }
  func.func @transform_12(%arg0: i32) -> (i32, i32) {
    %c0_i32 = arith.constant 0 : i32
    %c0_i32_0 = arith.constant 0 : i32
    %c0_i32_1 = arith.constant 0 : i32
    return %c0_i32, %c0_i32_0 : i32, i32
  }
  func.func @transform_13(%arg0: i32) -> (i32, i32, i32) {
    %c0_i32 = arith.constant 0 : i32
    %c0_i32_0 = arith.constant 0 : i32
    %c0_i32_1 = arith.constant 0 : i32
    %c0_i32_2 = arith.constant 0 : i32
    return %c0_i32, %c0_i32_0, %c0_i32_1 : i32, i32, i32
  }
  func.func @transform_14(%arg0: i32) -> (i32, i32, i32) {
    %c0_i32 = arith.constant 0 : i32
    %c0_i32_0 = arith.constant 0 : i32
    %c0_i32_1 = arith.constant 0 : i32
    %c0_i32_2 = arith.constant 0 : i32
    return %c0_i32, %c0_i32_0, %c0_i32_1 : i32, i32, i32
  }
  func.func @transform_15(%arg0: i32) -> (i32, i32) {
    %c0_i32 = arith.constant 0 : i32
    %c0_i32_0 = arith.constant 0 : i32
    %c0_i32_1 = arith.constant 0 : i32
    return %c0_i32, %c0_i32_0 : i32, i32
  }
  func.func @transform_16(%arg0: i32) -> (i32, i32, i32) {
    %c0_i32 = arith.constant 0 : i32
    %c0_i32_0 = arith.constant 0 : i32
    %c0_i32_1 = arith.constant 0 : i32
    %c0_i32_2 = arith.constant 0 : i32
    return %c0_i32, %c0_i32_0, %c0_i32_1 : i32, i32, i32
  }
  func.func @transform_17(%arg0: i32) -> (i32, i32, i32) {
    %c0_i32 = arith.constant 0 : i32
    %c0_i32_0 = arith.constant 0 : i32
    %c0_i32_1 = arith.constant 0 : i32
    %c0_i32_2 = arith.constant 0 : i32
    return %c0_i32, %c0_i32_0, %c0_i32_1 : i32, i32, i32
  }
  func.func @transform_18(%arg0: i32) -> (i32, i32) {
    %c0_i32 = arith.constant 0 : i32
    %c0_i32_0 = arith.constant 0 : i32
    %c0_i32_1 = arith.constant 0 : i32
    return %c0_i32, %c0_i32_0 : i32, i32
  }
  func.func @transform_19(%arg0: i32) -> (i32, i32, i32) {
    %c0_i32 = arith.constant 0 : i32
    %c0_i32_0 = arith.constant 0 : i32
    %c0_i32_1 = arith.constant 0 : i32
    %c0_i32_2 = arith.constant 0 : i32
    return %c0_i32, %c0_i32_0, %c0_i32_1 : i32, i32, i32
  }
  func.func @transform_20(%arg0: i32) -> (i32, i32, i32) {
    %c0_i32 = arith.constant 0 : i32
    %c0_i32_0 = arith.constant 0 : i32
    %c0_i32_1 = arith.constant 0 : i32
    %c0_i32_2 = arith.constant 0 : i32
    return %c0_i32, %c0_i32_0, %c0_i32_1 : i32, i32, i32
  }
  func.func @transform_21(%arg0: i32) -> (i32, i32) {
    %c0_i32 = arith.constant 0 : i32
    %c0_i32_0 = arith.constant 0 : i32
    %c0_i32_1 = arith.constant 0 : i32
    return %c0_i32, %c0_i32_0 : i32, i32
  }
  func.func @transform_22(%arg0: i32) -> (i32, i32, i32) {
    %c0_i32 = arith.constant 0 : i32
    %c0_i32_0 = arith.constant 0 : i32
    %c0_i32_1 = arith.constant 0 : i32
    return %arg0, %c0_i32, %c0_i32_0 : i32, i32, i32
  }
}

</mosaic_0001>

<bundles_post_ra>
// kernel: tile.54
= control target key start
LH: loop header
LB: loop body
LE: loop exit
PB: predicated region body
PF: predicated region fallthrough
CT: control target
= control target key end

     0   :  { %s40_s0 = inlined_call_operand.vmem [shape: f32[4], index: 0, kind: input, shape index: {}]   ;;  %s41_s1 = inlined_call_operand.vmem [shape: f32[32,4], index: 1, kind: output, shape index: {}]  }
   0x1   :  { %v4_v0 = vld [vmem:[%s40_s0] ss:$0 sm:$0xff] }
   0x2   :  { %5 = vst [vmem:[%s41_s1] sm:$0xff] %v4_v0 }
   0x3   :  { %12 = vst [vmem:[%s41_s1 + $0x8] sm:$0xff] %v4_v0 }
   0x4   :  { %13 = vst [vmem:[%s41_s1 + $0x10] sm:$0xff] %v4_v0 }
   0x5   :  { %14 = vst [vmem:[%s41_s1 + $0x18] sm:$0xff] %v4_v0 }

// kernel: tile.55
= control target key start
LH: loop header
LB: loop body
LE: loop exit
PB: predicated region body
PF: predicated region fallthrough
CT: control target
= control target key end

     0   :  { %s259_s10 = smov 124   ;;  %s260_s11 = smov 116   ;;  %vm3_vm0 = vcmask 31744   ;;  %vm9_vm1 = vcmask 1048544   ;;  %vm15_vm2 = vcmask 1015744   ;;  %vm21_vm3 = vcmask 982944   ;;  %s399_s0 = inlined_call_operand.vmem [shape: f32[32,4], index: 0, kind: input, shape index: {}]   ;;  %s400_s1 = inlined_call_operand.vmem [shape: f32[1,128], index: 1, kind: output, shape index: {}]  }
   0x1   :  { %v197_v0 = vld [vmem:[%s399_s0 + $0x1f] sm:$0x1]   ;;  %v199_v1 = vld [vmem:[%s399_s0 + $0x1d] sm:$0x1]   ;;  %v201_v2 = vld [vmem:[%s399_s0 + $0x1b] sm:$0x1]  }
   0x2   :  { %7 = vrot.lane.b32.xlu0 %v197_v0, %s259_s10  ;;  %19 = vrot.lane.b32.xlu1 %v199_v1, %s260_s11  ;;  %s261_s14 = smov 108   ;;  %v198_v3 = vld [vmem:[%s399_s0 + $0x1e] sm:$0x1]   ;;  %v200_v4 = vld [vmem:[%s399_s0 + $0x1c] sm:$0x1]   ;;  %s262_s19 = smov 120  }
   0x3   :  { %31 = vrot.lane.b32.xlu2 %v201_v2, %s261_s14  ;;  %s263_s20 = smov 112   ;;  %v202_v5 = vld [vmem:[%s399_s0 + $0x1a] sm:$0x1]   ;;  %s264_s23 = smov 104   ;;  %v203_v6 = vld [vmem:[%s399_s0 + $0x19] sm:$0x1]  }
   0x4   :  { %v204_v7 = vld [vmem:[%s399_s0 + $0x18] sm:$0x1]   ;;  %s265_s28 = smov 100   ;;  %s266_s29 = smov 96   ;;  %v205_v8 = vld [vmem:[%s399_s0 + $0x17] sm:$0x1]  }
   0x5   :  { %s267_s3 = smov 92   ;;  %v206_v9 = vld [vmem:[%s399_s0 + $0x16] sm:$0x1]   ;;  %v207_v10 = vld [vmem:[%s399_s0 + $0x15] sm:$0x1]   ;;  %s268_s8 = smov 88  }
   0x6   :  { %s269_s9 = smov 84   ;;  %v208_v11 = vld [vmem:[%s399_s0 + $0x14] sm:$0x1]   ;;  %s270_s12 = smov 80   ;;  %v209_v12 = vld [vmem:[%s399_s0 + $0x13] sm:$0x1]  }
   0x7   :  { %v210_v13 = vld [vmem:[%s399_s0 + $0x12] sm:$0x1]   ;;  %s271_s17 = smov 76   ;;  %s272_s18 = smov 72   ;;  %v211_v14 = vld [vmem:[%s399_s0 + $0x11] sm:$0x1]  }
   0x8   :  { %s273_s21 = smov 68   ;;  %v212_v15 = vld [vmem:[%s399_s0 + $0x10] sm:$0x1]   ;;  %v213_v16 = vld [vmem:[%s399_s0 + $0xf] sm:$0x1]   ;;  %s274_s26 = smov 64  }
   0x9   :  { %s275_s27 = smov 60   ;;  %v214_v17 = vld [vmem:[%s399_s0 + $0xe] sm:$0x1]   ;;  %s276_s30 = smov 56   ;;  %v215_v18 = vld [vmem:[%s399_s0 + $0xd] sm:$0x1]  }
   0xa   :  { %13 = vrot.lane.b32.xlu0 %v198_v3, %s262_s19  ;;  %25 = vrot.lane.b32.xlu1 %v200_v4, %s263_s20  ;;  %v216_v19 = vld [vmem:[%s399_s0 + $0xc] sm:$0x1]   ;;  %s277_s6 = smov 52   ;;  %s278_s7 = smov 48   ;;  %v217_v20 = vld [vmem:[%s399_s0 + $0xb] sm:$0x1]  }
   0xb   :  { %37 = vrot.lane.b32.xlu2 %v202_v5, %s264_s23  ;;  %s279_s10 = smov 44   ;;  %v218_v21 = vld [vmem:[%s399_s0 + $0xa] sm:$0x1]   ;;  %v219_v22 = vld [vmem:[%s399_s0 + $0x9] sm:$0x1]   ;;  %s280_s15 = smov 40  }
   0xc   :  { %s281_s16 = smov 36   ;;  %v220_v23 = vld [vmem:[%s399_s0 + $0x8] sm:$0x1]   ;;  %s282_s19 = smov 32   ;;  %v221_v24 = vld [vmem:[%s399_s0 + $0x7] sm:$0x1]  }
   0xd   :  { %v222_v25 = vld [vmem:[%s399_s0 + $0x6] sm:$0x1]   ;;  %s283_s24 = smov 28   ;;  %s284_s25 = smov 24   ;;  %v223_v26 = vld [vmem:[%s399_s0 + $0x5] sm:$0x1]  }
   0xe   :  { %v224_v27 = vld [vmem:[%s399_s0 + $0x4] sm:$0x1]   ;;  %v225_v28 = vld [vmem:[%s399_s0 + $0x3] sm:$0x1]   ;;  %s286_s4 = smov 16   ;;  %s287_s5 = smov 12  }
   0xf   :  { %v226_v29 = vld [vmem:[%s399_s0 + $0x2] sm:$0x1]   ;;  %v227_v30 = vld [vmem:[%s399_s0 + $0x1] sm:$0x1]   ;;  %s289_s11 = smov 4   ;;  %vm27_vm4 = vcmask 950144  }
  0x10   :  { %v2_v31 = vld [vmem:[%s399_s0] sm:$0x1]   ;;  %vm33_vm5 = vcmask 917344   ;;  %vm39_vm6 = vcmask 884544   ;;  %vm45_vm7 = vcmask 851744   ;;  %vm51_vm8 = vcmask 818944  }
  0x11   :  { %4 = vst.msk [vmem:[#allocation0] sm:$0x1] %vm3_vm0, %v2_v31   ;;  %vm57_vm9 = vcmask 786144   ;;  %vm63_vm10 = vcmask 753344   ;;  %vm69_vm11 = vcmask 720544   ;;  %vm75_vm12 = vcmask 687744  }
  0x12   :  { %43 = vrot.lane.b32.xlu0 %v203_v6, %s265_s28  ;;  %49 = vrot.lane.b32.xlu1 %v204_v7, %s266_s29  ;;  %s285_s28 = smov 20   ;;  %vm81_vm13 = vcmask 654944   ;;  %vm87_vm14 = vcmask 622144   ;;  %vm93_vm15 = vcmask 589344   ;;  %vm99_vm0 = vcmask 556544  }
  0x13   :  { %55 = vrot.lane.b32.xlu2 %v205_v8, %s267_s3 }
  0x1a   :  { %61 = vrot.lane.b32.xlu0 %v206_v9, %s268_s8  ;;  %67 = vrot.lane.b32.xlu1 %v207_v10, %s269_s9  ;;  %s288_s8 = smov 8  }
  0x1b   :  { %73 = vrot.lane.b32.xlu2 %v208_v11, %s270_s12 }
  0x22   :  { %79 = vrot.lane.b32.xlu0 %v209_v12, %s271_s17  ;;  %85 = vrot.lane.b32.xlu1 %v210_v13, %s272_s18 }
  0x23   :  { %91 = vrot.lane.b32.xlu2 %v211_v14, %s273_s21 }
  0x2a   :  { %97 = vrot.lane.b32.xlu0 %v212_v15, %s274_s26  ;;  %103 = vrot.lane.b32.xlu1 %v213_v16, %s275_s27 }
  0x2b   :  { %109 = vrot.lane.b32.xlu2 %v214_v17, %s276_s30 }
  0x32   :  { %115 = vrot.lane.b32.xlu0 %v215_v18, %s277_s6  ;;  %121 = vrot.lane.b32.xlu1 %v216_v19, %s278_s7 }
  0x33   :  { %127 = vrot.lane.b32.xlu2 %v217_v20, %s279_s10 }
  0x3a   :  { %133 = vrot.lane.b32.xlu0 %v218_v21, %s280_s15  ;;  %139 = vrot.lane.b32.xlu1 %v219_v22, %s281_s16 }
  0x3b   :  { %145 = vrot.lane.b32.xlu2 %v220_v23, %s282_s19 }
  0x42   :  { %151 = vrot.lane.b32.xlu0 %v221_v24, %s283_s24  ;;  %157 = vrot.lane.b32.xlu1 %v222_v25, %s284_s25 }
  0x43   :  { %163 = vrot.lane.b32.xlu2 %v223_v26, %s285_s28 }
  0x4a   :  { %169 = vrot.lane.b32.xlu0 %v224_v27, %s286_s4  ;;  %175 = vrot.lane.b32.xlu1 %v225_v28, %s287_s5 }
  0x4b   :  { %181 = vrot.lane.b32.xlu2 %v226_v29, %s288_s8 }
  0x52   :  { %187 = vrot.lane.b32.xlu0 %v227_v30, %s289_s11 }
  0x5d   :  { %v32_v32 = vpop.permute.xlu2 %31  }
  0x65   :  { %v38_v33 = vpop.permute.xlu2 %37  }
  0x6d   :  { %v56_v34 = vpop.permute.xlu2 %55  }
  0x74   :  { %v8_v35 = vpop.permute.xlu0 %7   ;;  %v20_v36 = vpop.permute.xlu1 %19  }
  0x75   :  { %10 = vst.msk [vmem:[#allocation0] sm:$0x1] %vm9_vm1, %v8_v35   ;;  %v74_v37 = vpop.permute.xlu2 %73   ;;  %vm105_vm1 = vcmask 523744  }
  0x7c   :  { %v14_v38 = vpop.permute.xlu0 %13   ;;  %v26_v39 = vpop.permute.xlu1 %25  }
  0x7d   :  { %16 = vst.msk [vmem:[#allocation0] sm:$0x1] %vm15_vm2, %v14_v38   ;;  %v92_v40 = vpop.permute.xlu2 %91   ;;  %vm111_vm2 = vcmask 490944  }
  0x7e   :  { %22 = vst.msk [vmem:[#allocation0] sm:$0x1] %vm21_vm3, %v20_v36   ;;  %vm117_vm3 = vcmask 458144  }
  0x7f   :  { %28 = vst.msk [vmem:[#allocation0] sm:$0x1] %vm27_vm4, %v26_v39   ;;  %vm123_vm4 = vcmask 425344  }
  0x80   :  { %34 = vst.msk [vmem:[#allocation0] sm:$0x1] %vm33_vm5, %v32_v32   ;;  %vm129_vm5 = vcmask 392544  }
  0x81   :  { %40 = vst.msk [vmem:[#allocation0] sm:$0x1] %vm39_vm6, %v38_v33   ;;  %vm135_vm6 = vcmask 359744  }
  0x84   :  { %v44_v41 = vpop.permute.xlu0 %43   ;;  %v50_v42 = vpop.permute.xlu1 %49  }
  0x85   :  { %46 = vst.msk [vmem:[#allocation0] sm:$0x1] %vm45_vm7, %v44_v41   ;;  %v110_v43 = vpop.permute.xlu2 %109   ;;  %vm141_vm7 = vcmask 326944  }
  0x86   :  { %52 = vst.msk [vmem:[#allocation0] sm:$0x1] %vm51_vm8, %v50_v42   ;;  %vm147_vm8 = vcmask 294144  }
  0x87   :  { %58 = vst.msk [vmem:[#allocation0] sm:$0x1] %vm57_vm9, %v56_v34   ;;  %vm153_vm9 = vcmask 261344  }
  0x8c   :  { %v62_v44 = vpop.permute.xlu0 %61   ;;  %v68_v45 = vpop.permute.xlu1 %67  }
  0x8d   :  { %64 = vst.msk [vmem:[#allocation0] sm:$0x1] %vm63_vm10, %v62_v44   ;;  %v128_v46 = vpop.permute.xlu2 %127   ;;  %vm159_vm10 = vcmask 228544  }
  0x8e   :  { %70 = vst.msk [vmem:[#allocation0] sm:$0x1] %vm69_vm11, %v68_v45   ;;  %vm165_vm11 = vcmask 195744  }
  0x8f   :  { %76 = vst.msk [vmem:[#allocation0] sm:$0x1] %vm75_vm12, %v74_v37   ;;  %vm171_vm12 = vcmask 162944  }
  0x94   :  { %v80_v47 = vpop.permute.xlu0 %79   ;;  %v86_v48 = vpop.permute.xlu1 %85  }
  0x95   :  { %82 = vst.msk [vmem:[#allocation0] sm:$0x1] %vm81_vm13, %v80_v47   ;;  %v146_v49 = vpop.permute.xlu2 %145   ;;  %vm177_vm13 = vcmask 130144  }
  0x96   :  { %88 = vst.msk [vmem:[#allocation0] sm:$0x1] %vm87_vm14, %v86_v48   ;;  %vm183_vm14 = vcmask 97344  }
  0x97   :  { %94 = vst.msk [vmem:[#allocation0] sm:$0x1] %vm93_vm15, %v92_v40   ;;  %vm189_vm15 = vcmask 64544  }
  0x9c   :  { %v98_v50 = vpop.permute.xlu0 %97   ;;  %v104_v51 = vpop.permute.xlu1 %103  }
  0x9d   :  { %100 = vst.msk [vmem:[#allocation0] sm:$0x1] %vm99_vm0, %v98_v50   ;;  %v164_v52 = vpop.permute.xlu2 %163  }
  0x9e   :  { %106 = vst.msk [vmem:[#allocation0] sm:$0x1] %vm105_vm1, %v104_v51  }
  0x9f   :  { %112 = vst.msk [vmem:[#allocation0] sm:$0x1] %vm111_vm2, %v110_v43  }
  0xa4   :  { %v116_v53 = vpop.permute.xlu0 %115   ;;  %v122_v54 = vpop.permute.xlu1 %121  }
  0xa5   :  { %118 = vst.msk [vmem:[#allocation0] sm:$0x1] %vm117_vm3, %v116_v53   ;;  %v182_v55 = vpop.permute.xlu2 %181  }
  0xa6   :  { %124 = vst.msk [vmem:[#allocation0] sm:$0x1] %vm123_vm4, %v122_v54  }
  0xa7   :  { %130 = vst.msk [vmem:[#allocation0] sm:$0x1] %vm129_vm5, %v128_v46  }
  0xac   :  { %v134_v56 = vpop.permute.xlu0 %133   ;;  %v140_v57 = vpop.permute.xlu1 %139  }
  0xad   :  { %136 = vst.msk [vmem:[#allocation0] sm:$0x1] %vm135_vm6, %v134_v56  }
  0xae   :  { %142 = vst.msk [vmem:[#allocation0] sm:$0x1] %vm141_vm7, %v140_v57  }
  0xaf   :  { %148 = vst.msk [vmem:[#allocation0] sm:$0x1] %vm147_vm8, %v146_v49  }
  0xb4   :  { %v152_v58 = vpop.permute.xlu0 %151   ;;  %v158_v59 = vpop.permute.xlu1 %157  }
  0xb5   :  { %154 = vst.msk [vmem:[#allocation0] sm:$0x1] %vm153_vm9, %v152_v58  }
  0xb6   :  { %160 = vst.msk [vmem:[#allocation0] sm:$0x1] %vm159_vm10, %v158_v59  }
  0xb7   :  { %166 = vst.msk [vmem:[#allocation0] sm:$0x1] %vm165_vm11, %v164_v52  }
  0xbc   :  { %v170_v60 = vpop.permute.xlu0 %169   ;;  %v176_v61 = vpop.permute.xlu1 %175  }
  0xbd   :  { %172 = vst.msk [vmem:[#allocation0] sm:$0x1] %vm171_vm12, %v170_v60  }
  0xbe   :  { %178 = vst.msk [vmem:[#allocation0] sm:$0x1] %vm177_vm13, %v176_v61  }
  0xbf   :  { %184 = vst.msk [vmem:[#allocation0] sm:$0x1] %vm183_vm14, %v182_v55  }
  0xc4   :  { %v188_v62 = vpop.permute.xlu0 %187  }
  0xc5   :  { %190 = vst.msk [vmem:[#allocation0] sm:$0x1] %vm189_vm15, %v188_v62  }
  0xcc   :  { %v193_v63 = vld [vmem:[#allocation0] sm:$0x1] }
  0xcd   :  { %196 = vst [vmem:[%s400_s1] sm:$0x1] %v193_v63 }

// kernel: tile.30
= control target key start
LH: loop header
LB: loop body
LE: loop exit
PB: predicated region body
PF: predicated region fallthrough
CT: control target
= control target key end

     0   :  { %s28_s0 = inlined_call_operand.vmem [shape: f32[4], index: 0, kind: input, shape index: {}]   ;;  %s29_s1 = inlined_call_operand.vmem [shape: f32[16,4], index: 1, kind: output, shape index: {}]  }
   0x1   :  { %v4_v0 = vld [vmem:[%s28_s0] ss:$0 sm:$0xff] }
   0x2   :  { %5 = vst [vmem:[%s29_s1] sm:$0xff] %v4_v0 }
   0x3   :  { %8 = vst [vmem:[%s29_s1 + $0x8] sm:$0xff] %v4_v0 }

// kernel: tile.31
= control target key start
LH: loop header
LB: loop body
LE: loop exit
PB: predicated region body
PF: predicated region fallthrough
CT: control target
= control target key end

     0   :  { %s131_s10 = smov 60   ;;  %s132_s11 = smov 52   ;;  %vm3_vm0 = vcmask 31744   ;;  %vm9_vm1 = vcmask 523744   ;;  %vm15_vm2 = vcmask 490944   ;;  %vm21_vm3 = vcmask 458144   ;;  %s207_s0 = inlined_call_operand.vmem [shape: f32[16,4], index: 0, kind: input, shape index: {}]   ;;  %s208_s1 = inlined_call_operand.vmem [shape: f32[1,64], index: 1, kind: output, shape index: {}]  }
   0x1   :  { %v101_v0 = vld [vmem:[%s207_s0 + $0xf] sm:$0x1]   ;;  %v103_v1 = vld [vmem:[%s207_s0 + $0xd] sm:$0x1]   ;;  %v105_v2 = vld [vmem:[%s207_s0 + $0xb] sm:$0x1]  }
   0x2   :  { %7 = vrot.lane.b32.xlu0 %v101_v0, %s131_s10  ;;  %19 = vrot.lane.b32.xlu1 %v103_v1, %s132_s11  ;;  %s133_s14 = smov 44   ;;  %v102_v3 = vld [vmem:[%s207_s0 + $0xe] sm:$0x1]   ;;  %v104_v4 = vld [vmem:[%s207_s0 + $0xc] sm:$0x1]   ;;  %s134_s19 = smov 56  }
   0x3   :  { %31 = vrot.lane.b32.xlu2 %v105_v2, %s133_s14  ;;  %s135_s20 = smov 48   ;;  %v106_v5 = vld [vmem:[%s207_s0 + $0xa] sm:$0x1]   ;;  %s136_s23 = smov 40   ;;  %v107_v6 = vld [vmem:[%s207_s0 + $0x9] sm:$0x1]  }
   0x4   :  { %v108_v7 = vld [vmem:[%s207_s0 + $0x8] sm:$0x1]   ;;  %s137_s28 = smov 36   ;;  %s138_s29 = smov 32   ;;  %v109_v8 = vld [vmem:[%s207_s0 + $0x7] sm:$0x1]  }
   0x5   :  { %s139_s3 = smov 28   ;;  %v110_v9 = vld [vmem:[%s207_s0 + $0x6] sm:$0x1]   ;;  %v111_v10 = vld [vmem:[%s207_s0 + $0x5] sm:$0x1]   ;;  %s140_s8 = smov 24  }
   0x6   :  { %s141_s9 = smov 20   ;;  %v112_v11 = vld [vmem:[%s207_s0 + $0x4] sm:$0x1]   ;;  %s142_s12 = smov 16   ;;  %v113_v12 = vld [vmem:[%s207_s0 + $0x3] sm:$0x1]  }
   0x7   :  { %v114_v13 = vld [vmem:[%s207_s0 + $0x2] sm:$0x1]   ;;  %s143_s17 = smov 12   ;;  %s144_s18 = smov 8   ;;  %v115_v14 = vld [vmem:[%s207_s0 + $0x1] sm:$0x1]  }
   0x8   :  { %s145_s21 = smov 4   ;;  %v2_v15 = vld [vmem:[%s207_s0] sm:$0x1]   ;;  %vm27_vm4 = vcmask 425344   ;;  %vm33_vm5 = vcmask 392544   ;;  %vm39_vm6 = vcmask 359744  }
   0x9   :  { %4 = vst.msk [vmem:[#allocation0] sm:$0x1] %vm3_vm0, %v2_v15   ;;  %vm45_vm7 = vcmask 326944   ;;  %vm51_vm8 = vcmask 294144   ;;  %vm57_vm9 = vcmask 261344   ;;  %vm63_vm10 = vcmask 228544  }
   0xa   :  { %13 = vrot.lane.b32.xlu0 %v102_v3, %s134_s19  ;;  %25 = vrot.lane.b32.xlu1 %v104_v4, %s135_s20  ;;  %vm69_vm11 = vcmask 195744   ;;  %vm75_vm12 = vcmask 162944   ;;  %vm81_vm13 = vcmask 130144   ;;  %vm87_vm14 = vcmask 97344  }
   0xb   :  { %37 = vrot.lane.b32.xlu2 %v106_v5, %s136_s23  ;;  %vm93_vm15 = vcmask 64544  }
  0x12   :  { %43 = vrot.lane.b32.xlu0 %v107_v6, %s137_s28  ;;  %49 = vrot.lane.b32.xlu1 %v108_v7, %s138_s29 }
  0x13   :  { %55 = vrot.lane.b32.xlu2 %v109_v8, %s139_s3 }
  0x1a   :  { %61 = vrot.lane.b32.xlu0 %v110_v9, %s140_s8  ;;  %67 = vrot.lane.b32.xlu1 %v111_v10, %s141_s9 }
  0x1b   :  { %73 = vrot.lane.b32.xlu2 %v112_v11, %s142_s12 }
  0x22   :  { %79 = vrot.lane.b32.xlu0 %v113_v12, %s143_s17  ;;  %85 = vrot.lane.b32.xlu1 %v114_v13, %s144_s18 }
  0x23   :  { %91 = vrot.lane.b32.xlu2 %v115_v14, %s145_s21 }
  0x5d   :  { %v32_v16 = vpop.permute.xlu2 %31  }
  0x65   :  { %v38_v17 = vpop.permute.xlu2 %37  }
  0x6d   :  { %v56_v18 = vpop.permute.xlu2 %55  }
  0x74   :  { %v8_v19 = vpop.permute.xlu0 %7   ;;  %v20_v20 = vpop.permute.xlu1 %19  }
  0x75   :  { %10 = vst.msk [vmem:[#allocation0] sm:$0x1] %vm9_vm1, %v8_v19   ;;  %v74_v21 = vpop.permute.xlu2 %73  }
  0x7c   :  { %v14_v22 = vpop.permute.xlu0 %13   ;;  %v26_v23 = vpop.permute.xlu1 %25  }
  0x7d   :  { %16 = vst.msk [vmem:[#allocation0] sm:$0x1] %vm15_vm2, %v14_v22   ;;  %v92_v24 = vpop.permute.xlu2 %91  }
  0x7e   :  { %22 = vst.msk [vmem:[#allocation0] sm:$0x1] %vm21_vm3, %v20_v20  }
  0x7f   :  { %28 = vst.msk [vmem:[#allocation0] sm:$0x1] %vm27_vm4, %v26_v23  }
  0x80   :  { %34 = vst.msk [vmem:[#allocation0] sm:$0x1] %vm33_vm5, %v32_v16  }
  0x81   :  { %40 = vst.msk [vmem:[#allocation0] sm:$0x1] %vm39_vm6, %v38_v17  }
  0x84   :  { %v44_v25 = vpop.permute.xlu0 %43   ;;  %v50_v26 = vpop.permute.xlu1 %49  }
  0x85   :  { %46 = vst.msk [vmem:[#allocation0] sm:$0x1] %vm45_vm7, %v44_v25  }
  0x86   :  { %52 = vst.msk [vmem:[#allocation0] sm:$0x1] %vm51_vm8, %v50_v26  }
  0x87   :  { %58 = vst.msk [vmem:[#allocation0] sm:$0x1] %vm57_vm9, %v56_v18  }
  0x8c   :  { %v62_v27 = vpop.permute.xlu0 %61   ;;  %v68_v28 = vpop.permute.xlu1 %67  }
  0x8d   :  { %64 = vst.msk [vmem:[#allocation0] sm:$0x1] %vm63_vm10, %v62_v27  }
  0x8e   :  { %70 = vst.msk [vmem:[#allocation0] sm:$0x1] %vm69_vm11, %v68_v28  }
  0x8f   :  { %76 = vst.msk [vmem:[#allocation0] sm:$0x1] %vm75_vm12, %v74_v21  }
  0x94   :  { %v80_v29 = vpop.permute.xlu0 %79   ;;  %v86_v30 = vpop.permute.xlu1 %85  }
  0x95   :  { %82 = vst.msk [vmem:[#allocation0] sm:$0x1] %vm81_vm13, %v80_v29  }
  0x96   :  { %88 = vst.msk [vmem:[#allocation0] sm:$0x1] %vm87_vm14, %v86_v30  }
  0x97   :  { %94 = vst.msk [vmem:[#allocation0] sm:$0x1] %vm93_vm15, %v92_v24  }
  0x9e   :  { %v97_v31 = vld [vmem:[#allocation0] sm:$0x1] }
  0x9f   :  { %100 = vst [vmem:[%s208_s1] sm:$0x1] %v97_v31 }

// kernel: tile.34
= control target key start
LH: loop header
LB: loop body
LE: loop exit
PB: predicated region body
PF: predicated region fallthrough
CT: control target
= control target key end

     0   :  { %s22_s0 = inlined_call_operand.vmem [shape: f32[4], index: 0, kind: input, shape index: {}]   ;;  %s23_s1 = inlined_call_operand.vmem [shape: f32[8,4], index: 1, kind: output, shape index: {}]  }
   0x1   :  { %v4_v0 = vld [vmem:[%s22_s0] ss:$0 sm:$0xff] }
   0x2   :  { %5 = vst [vmem:[%s23_s1] sm:$0xff] %v4_v0 }

// kernel: tile.35
= control target key start
LH: loop header
LB: loop body
LE: loop exit
PB: predicated region body
PF: predicated region fallthrough
CT: control target
= control target key end

     0   :  { %s67_s10 = smov 28   ;;  %s68_s11 = smov 20   ;;  %vm3_vm0 = vcmask 31744   ;;  %vm9_vm1 = vcmask 261344   ;;  %vm15_vm2 = vcmask 228544   ;;  %vm21_vm3 = vcmask 195744   ;;  %s111_s0 = inlined_call_operand.vmem [shape: f32[8,4], index: 0, kind: input, shape index: {}]   ;;  %s112_s1 = inlined_call_operand.vmem [shape: f32[1,32], index: 1, kind: output, shape index: {}]  }
   0x1   :  { %v53_v0 = vld [vmem:[%s111_s0 + $0x7] sm:$0x1]   ;;  %v55_v1 = vld [vmem:[%s111_s0 + $0x5] sm:$0x1]   ;;  %v57_v2 = vld [vmem:[%s111_s0 + $0x3] sm:$0x1]  }
   0x2   :  { %7 = vrot.lane.b32.xlu0 %v53_v0, %s67_s10  ;;  %19 = vrot.lane.b32.xlu1 %v55_v1, %s68_s11  ;;  %s69_s14 = smov 12   ;;  %v54_v3 = vld [vmem:[%s111_s0 + $0x6] sm:$0x1]   ;;  %v56_v4 = vld [vmem:[%s111_s0 + $0x4] sm:$0x1]   ;;  %s70_s21 = smov 24  }
   0x3   :  { %31 = vrot.lane.b32.xlu2 %v57_v2, %s69_s14  ;;  %v58_v5 = vld [vmem:[%s111_s0 + $0x2] sm:$0x1]   ;;  %s71_s22 = smov 16   ;;  %s72_s23 = smov 8   ;;  %v59_v6 = vld [vmem:[%s111_s0 + $0x1] sm:$0x1]  }
   0x4   :  { %s73_s26 = smov 4   ;;  %v2_v7 = vld [vmem:[%s111_s0] sm:$0x1]   ;;  %vm27_vm4 = vcmask 162944   ;;  %vm33_vm5 = vcmask 130144   ;;  %vm39_vm6 = vcmask 97344  }
   0x5   :  { %4 = vst.msk [vmem:[#allocation0] sm:$0x1] %vm3_vm0, %v2_v7   ;;  %vm45_vm7 = vcmask 64544  }
   0xa   :  { %13 = vrot.lane.b32.xlu0 %v54_v3, %s70_s21  ;;  %25 = vrot.lane.b32.xlu1 %v56_v4, %s71_s22 }
   0xb   :  { %37 = vrot.lane.b32.xlu2 %v58_v5, %s72_s23 }
  0x12   :  { %43 = vrot.lane.b32.xlu0 %v59_v6, %s73_s26 }
  0x5d   :  { %v32_v8 = vpop.permute.xlu2 %31  }
  0x65   :  { %v38_v9 = vpop.permute.xlu2 %37  }
  0x74   :  { %v8_v10 = vpop.permute.xlu0 %7   ;;  %v20_v11 = vpop.permute.xlu1 %19  }
  0x75   :  { %10 = vst.msk [vmem:[#allocation0] sm:$0x1] %vm9_vm1, %v8_v10  }
  0x7c   :  { %v14_v12 = vpop.permute.xlu0 %13   ;;  %v26_v13 = vpop.permute.xlu1 %25  }
  0x7d   :  { %16 = vst.msk [vmem:[#allocation0] sm:$0x1] %vm15_vm2, %v14_v12  }
  0x7e   :  { %22 = vst.msk [vmem:[#allocation0] sm:$0x1] %vm21_vm3, %v20_v11  }
  0x7f   :  { %28 = vst.msk [vmem:[#allocation0] sm:$0x1] %vm27_vm4, %v26_v13  }
  0x80   :  { %34 = vst.msk [vmem:[#allocation0] sm:$0x1] %vm33_vm5, %v32_v8  }
  0x81   :  { %40 = vst.msk [vmem:[#allocation0] sm:$0x1] %vm39_vm6, %v38_v9  }
  0x84   :  { %v44_v14 = vpop.permute.xlu0 %43  }
  0x85   :  { %46 = vst.msk [vmem:[#allocation0] sm:$0x1] %vm45_vm7, %v44_v14  }
  0x8c   :  { %v49_v15 = vld [vmem:[#allocation0] sm:$0x1] }
  0x8d   :  { %52 = vst [vmem:[%s112_s1] sm:$0x1] %v49_v15 }

// kernel: tile.38
= control target key start
LH: loop header
LB: loop body
LE: loop exit
PB: predicated region body
PF: predicated region fallthrough
CT: control target
= control target key end

     0   :  { %s22_s0 = inlined_call_operand.vmem [shape: f32[4], index: 0, kind: input, shape index: {}]   ;;  %s23_s1 = inlined_call_operand.vmem [shape: f32[4,4], index: 1, kind: output, shape index: {}]  }
   0x1   :  { %v4_v0 = vld [vmem:[%s22_s0] ss:$0 sm:$0xff] }
   0x2   :  { %5 = vst [vmem:[%s23_s1] sm:$0xf] %v4_v0 }

// kernel: tile.39
= control target key start
LH: loop header
LB: loop body
LE: loop exit
PB: predicated region body
PF: predicated region fallthrough
CT: control target
= control target key end

     0   :  { %s37_s8 = smov 4   ;;  %s38_s9 = smov 8   ;;  %vm7_vm0 = vcmask 31744   ;;  %vm13_vm1 = vcmask 130144   ;;  %vm19_vm2 = vcmask 97344   ;;  %vm25_vm3 = vcmask 64544   ;;  %s55_s0 = inlined_call_operand.vmem [shape: f32[4,4], index: 0, kind: input, shape index: {}]   ;;  %s56_s1 = inlined_call_operand.vmem [shape: f32[1,16], index: 1, kind: output, shape index: {}]  }
   0x1   :  { %v4_v0 = vld [vmem:[%s55_s0] sm:$0xf]  ;;  %s36_s0 = smov 12  }
   0x2   :  { %5 = vst [vmem:[#allocation1] sm:$0xf] %v4_v0 }
   0x9   :  { %v10_v1 = vld [vmem:[#allocation1 + $0x3] sm:$0x1]   ;;  %v22_v2 = vld [vmem:[#allocation1 + $0x1] sm:$0x1]   ;;  %v16_v3 = vld [vmem:[#allocation1 + $0x2] sm:$0x1]  }
   0xa   :  { %11 = vrot.lane.b32.xlu0 %v10_v1, %s36_s0  ;;  %23 = vrot.lane.b32.xlu1 %v22_v2, %s37_s8  ;;  %v6_v4 = vld [vmem:[#allocation1] sm:$0x1]  }
   0xb   :  { %8 = vst.msk [vmem:[#allocation0] sm:$0x1] %vm7_vm0, %v6_v4  }
  0x12   :  { %17 = vrot.lane.b32.xlu0 %v16_v3, %s38_s9 }
  0x7c   :  { %v12_v5 = vpop.permute.xlu0 %11   ;;  %v24_v6 = vpop.permute.xlu1 %23  }
  0x7d   :  { %14 = vst.msk [vmem:[#allocation0] sm:$0x1] %vm13_vm1, %v12_v5  }
  0x84   :  { %v18_v7 = vpop.permute.xlu0 %17  }
  0x85   :  { %20 = vst.msk [vmem:[#allocation0] sm:$0x1] %vm19_vm2, %v18_v7  }
  0x86   :  { %26 = vst.msk [vmem:[#allocation0] sm:$0x1] %vm25_vm3, %v24_v6  }
  0x8d   :  { %v29_v8 = vld [vmem:[#allocation0] sm:$0x1] }
  0x8e   :  { %32 = vst [vmem:[%s56_s1] sm:$0x1] %v29_v8 }

// kernel: _lambda_.1
= control target key start
LH: loop header
LB: loop body
LE: loop exit
PB: predicated region body
PF: predicated region fallthrough
CT: control target
= control target key end

     0   :  { %vm76_vm0 = vcmask 130048   ;;  %vm380_vm2 = vcmask 1043456   ;;  %vm376_vm3 = vcmask 64512   ;;  %vm458_vm4 = vcmask 523264   ;;  %s2439_s0 = inlined_call_operand.vmem [shape: f32[1,16,128], index: 0, kind: input, shape index: {}]   ;;  %s2440_s2 = inlined_call_operand.vmem [shape: bf16[3,128,64], index: 2, kind: input, shape index: {}]   ;;  %s2441_s1 = inlined_call_operand.vmem [shape: bf16[3,8,16], index: 1, kind: input, shape index: {}]   ;;  %s2442_s3 = inlined_call_operand.vmem [shape: f32[1,64], index: 3, kind: input, shape index: {}]   ;;  %s2443_s5 = inlined_call_operand.vmem [shape: bf16[3,64,32], index: 5, kind: input, shape index: {}]   ;;  %s2444_s4 = inlined_call_operand.vmem [shape: bf16[3,4,8], index: 4, kind: input, shape index: {}]   ;;  %s2445_s6 = inlined_call_operand.vmem [shape: f32[1,32], index: 6, kind: input, shape index: {}]   ;;  %s2446_s8 = inlined_call_operand.vmem [shape: bf16[3,32,16], index: 8, kind: input, shape index: {}]   ;;  %s2447_s7 = inlined_call_operand.vmem [shape: bf16[3,2,4], index: 7, kind: input, shape index: {}]   ;;  %s2448_s9 = inlined_call_operand.vmem [shape: f32[1,16], index: 9, kind: input, shape index: {}]   ;;  %s2449_s10 = inlined_call_operand.vmem [shape: bf16[3,2,2], index: 10, kind: input, shape index: {}]   ;;  %s2450_s11 = inlined_call_operand.vmem [shape: bf16[3,16,16], index: 11, kind: input, shape index: {}]   ;;  %s2451_s12 = inlined_call_operand.vmem [shape: f32[1,16], index: 12, kind: input, shape index: {}]   ;;  %s2452_s13 = inlined_call_operand.vmem [shape: bf16[3,4,2], index: 13, kind: input, shape index: {}]   ;;  %s2453_s14 = inlined_call_operand.vmem [shape: bf16[3,16,32], index: 14, kind: input, shape index: {}]   ;;  %s2454_s15 = inlined_call_operand.vmem [shape: f32[1,32], index: 15, kind: input, shape index: {}]   ;;  %s2455_s17 = inlined_call_operand.vmem [shape: bf16[3,32,64], index: 17, kind: input, shape index: {}]   ;;  %s2456_s16 = inlined_call_operand.vmem [shape: bf16[3,8,4], index: 16, kind: input, shape index: {}]   ;;  %s2457_s18 = inlined_call_operand.vmem [shape: f32[1,64], index: 18, kind: input, shape index: {}]   ;;  %s2458_s20 = inlined_call_operand.vmem [shape: bf16[3,64,128], index: 20, kind: input, shape index: {}]   ;;  %s2459_s19 = inlined_call_operand.vmem [shape: bf16[3,16,8], index: 19, kind: input, shape index: {}]   ;;  %s2460_s21 = inlined_call_operand.vmem [shape: f32[1,128], index: 21, kind: input, shape index: {}]   ;;  %s2461_s22 = inlined_call_operand.vmem [shape: f32[1,16,128], index: 22, kind: output, shape index: {}]  }
   0x1   :  { %2467 = sst [smem:[#allocation2_spill]] %s2439_s0  ;;  %vm598_vm6 = vcmask 1041408   ;;  %vm594_vm7 = vcmask 31744   ;;  %vm656_vm8 = vcmask 261120   ;;  %vm768_vm10 = vcmask 1040384  }
   0x2   :  { %2468 = sst [smem:[#allocation3_spill]] %s2440_s2  ;;  %vm764_vm11 = vcmask 15360  }
   0x3   :  { %2469 = sst [smem:[#allocation4_spill]] %s2441_s1 }
   0x4   :  { %2470 = sst [smem:[#allocation5_spill]] %s2442_s3 }
   0x5   :  { %2471 = sst [smem:[#allocation6_spill]] %s2443_s5 }
   0x6   :  { %2472 = sst [smem:[#allocation7_spill]] %s2444_s4 }
   0x7   :  { %2473 = sst [smem:[#allocation8_spill]] %s2445_s6 }
   0x8   :  { %s2474_s29 = sld [smem:[#allocation2_spill]] }
   0x9   :  { %s2475_s2 = sld [smem:[#allocation3_spill]] }
   0xa   :  { %s2476_s26 = sld [smem:[#allocation4_spill]] }
   0xb   :  { %s2477_s4 = sld [smem:[#allocation6_spill]] }
   0xc   :  { %s2478_s1 = sld [smem:[#allocation5_spill]] }
   0xd   :  { %s2480_s28 = sld [smem:[#allocation8_spill]] }
   0xe   :  { %v2085_v0 = vld [vmem:[%s2474_s29] sm:$0xff]  ;;  %v2090_v1 = vld [vmem:[%s2474_s29 + $0x8] sm:$0xff] }
   0xf   :  { %v74_v2 = vpack.c.bf16 %v2090_v1, %v2085_v0  ;;  %v1906_v3 = vld [vmem:[%s2475_s2 + $0x78] sm:$0xff]  ;;  %v1905_v7 = vld [vmem:[%s2475_s2 + $0x70] sm:$0xff]  ;;  %v1904_v11 = vld [vmem:[%s2475_s2 + $0x68] sm:$0xff] }
  0x10   :  { %v1898_v4 = vld [vmem:[%s2475_s2 + $0x38] sm:$0xff]  ;;  %v75_v5 = vld [vmem:[%s2476_s26] sm:$0xf]  ;;  %v1473_v6 = vld [vmem:[%s2476_s26 + $0x4] sm:$0xf]  ;;  %194 = vmatpush.bf16.msra.mxu2 %v1906_v3 }
  0x11   :  { %87 = vmatpush.bf16.msra.mxu0 %v74_v2  ;;  %122 = vmatpush.bf16.msra.mxu1 %v74_v2  ;;  %v1897_v8 = vld [vmem:[%s2475_s2 + $0x30] sm:$0xff]  ;;  %v1914_v9 = vld [vmem:[%s2475_s2 + $0xb8] sm:$0xff]  ;;  %v1896_v12 = vld [vmem:[%s2475_s2 + $0x28] sm:$0xff] }
  0x12   :  { %255 = vmatpush.bf16.msra.mxu3 %v1898_v4  ;;  %v1913_v10 = vld [vmem:[%s2475_s2 + $0xb0] sm:$0xff]  ;;  %v1912_v13 = vld [vmem:[%s2475_s2 + $0xa8] sm:$0xff]  ;;  %v1903_v14 = vld [vmem:[%s2475_s2 + $0x60] sm:$0xff] }
  0x13   :  { %v1895_v15 = vld [vmem:[%s2475_s2 + $0x20] sm:$0xff]  ;;  %v1902_v16 = vld [vmem:[%s2475_s2 + $0x58] sm:$0xff]  ;;  %v1555_v18 = vld [vmem:[%s2476_s26 + $0x8] sm:$0xf]  ;;  %s2479_s26 = sld [smem:[#allocation7_spill]] }
  0x14   :  { %1472 = vmatmul.msk.bf16.vlgmr.msra.gmra.mxu0 %vm76_vm0, %v75_v5  ;;  %1474 = vmatmul.msk.bf16.vlgmr.msra.gmra.mxu1 %vm76_vm0, %v1473_v6  ;;  %v1894_v17 = vld [vmem:[%s2475_s2 + $0x18] sm:$0xff]  ;;  %v1901_v19 = vld [vmem:[%s2475_s2 + $0x50] sm:$0xff]  ;;  %v1900_v21 = vld [vmem:[%s2475_s2 + $0x48] sm:$0xff] }
  0x15   :  { %280 = vmatpush.bf16.msrb.mxu0 %v74_v2  ;;  %352 = vmatpush.bf16.msrb.mxu1 %v1914_v9  ;;  %v1893_v20 = vld [vmem:[%s2475_s2 + $0x10] sm:$0xff]  ;;  %v1892_v22 = vld [vmem:[%s2475_s2 + $0x8] sm:$0xff]  ;;  %v1899_v23 = vld [vmem:[%s2475_s2 + $0x40] sm:$0xff] }
  0x16   :  { %195 = vmatpush.bf16.msra.mxu2 %v1905_v7  ;;  %256 = vmatpush.bf16.msra.mxu3 %v1897_v8  ;;  %v1891_v24 = vld [vmem:[%s2475_s2] sm:$0xff]  ;;  %v1910_v26 = vld [vmem:[%s2475_s2 + $0x98] sm:$0xff]  ;;  %v1909_v27 = vld [vmem:[%s2475_s2 + $0x90] sm:$0xff] }
  0x17   :  { %v1911_v25 = vld [vmem:[%s2475_s2 + $0xa0] sm:$0xff]  ;;  %v1908_v28 = vld [vmem:[%s2475_s2 + $0x88] sm:$0xff]  ;;  %v1922_v39 = vld [vmem:[%s2477_s4 + $0x38] sm:$0xff] }
  0x18   :  { %v1907_v29 = vld [vmem:[%s2475_s2 + $0x80] sm:$0xff]  ;;  %v1921_v40 = vld [vmem:[%s2477_s4 + $0x30] sm:$0xff]  ;;  %v1926_v54 = vld [vmem:[%s2477_s4 + $0x58] sm:$0xff] }
  0x19   :  { %353 = vmatpush.bf16.msrb.mxu1 %v1913_v10  ;;  %v1960_v46 = vld [vmem:[%s2478_s1] ss:$0 sm:$0xff]  ;;  %v1918_v55 = vld [vmem:[%s2477_s4 + $0x18] sm:$0xff]  ;;  %v1606_v57 = vld [vmem:[%s2479_s26 + $0x2] sm:$0x3] }
  0x1a   :  { %196 = vmatpush.bf16.msra.mxu2 %v1904_v11  ;;  %257 = vmatpush.bf16.msra.mxu3 %v1896_v12  ;;  %v375_v58 = vld [vmem:[%s2479_s26] sm:$0x3]  ;;  %v1650_v59 = vld [vmem:[%s2479_s26 + $0x4] sm:$0x3]  ;;  %v1925_v60 = vld [vmem:[%s2477_s4 + $0x50] sm:$0xff] }
  0x1b   :  { %v1917_v61 = vld [vmem:[%s2477_s4 + $0x10] sm:$0xff]  ;;  %v1924_v62 = vld [vmem:[%s2477_s4 + $0x48] sm:$0xff]  ;;  %v1923_v2 = vld [vmem:[%s2477_s4 + $0x40] sm:$0xff] }
  0x1c   :  { %v1916_v63 = vld [vmem:[%s2477_s4 + $0x8] sm:$0xff]  ;;  %v1915_v4 = vld [vmem:[%s2477_s4] sm:$0xff] }
  0x1d   :  { %354 = vmatpush.bf16.msrb.mxu1 %v1912_v13  ;;  %v1920_v3 = vld [vmem:[%s2477_s4 + $0x28] sm:$0xff]  ;;  %v1919_v5 = vld [vmem:[%s2477_s4 + $0x20] sm:$0xff] }
  0x1e   :  { %197 = vmatpush.bf16.msra.mxu2 %v1903_v14  ;;  %258 = vmatpush.bf16.msra.mxu3 %v1895_v15 }
  0x21   :  { %355 = vmatpush.bf16.msrb.mxu1 %v1911_v25 }
  0x22   :  { %198 = vmatpush.bf16.msra.mxu2 %v1902_v16  ;;  %259 = vmatpush.bf16.msra.mxu3 %v1894_v17 }
  0x24   :  { %1556 = vmatmul.msk.bf16.vlgmr.msrb.gmra.mxu0 %vm76_vm0, %v1555_v18 }
  0x25   :  { %356 = vmatpush.bf16.msrb.mxu1 %v1910_v26 }
  0x26   :  { %199 = vmatpush.bf16.msra.mxu2 %v1901_v19  ;;  %260 = vmatpush.bf16.msra.mxu3 %v1893_v20  ;;  %v1928_v19 = vld [vmem:[%s2446_s8 + $0x8] sm:$0xff] }
  0x29   :  { %357 = vmatpush.bf16.msrb.mxu1 %v1909_v27 }
  0x2a   :  { %200 = vmatpush.bf16.msra.mxu2 %v1900_v21  ;;  %261 = vmatpush.bf16.msra.mxu3 %v1892_v22  ;;  %v1961_v21 = vld [vmem:[%s2480_s28] ss:$0 sm:$0xff] }
  0x2d   :  { %358 = vmatpush.bf16.msrb.mxu1 %v1908_v28 }
  0x2e   :  { %201 = vmatpush.bf16.msra.mxu2 %v1899_v23  ;;  %262 = vmatpush.bf16.msra.mxu3 %v1891_v24 }
  0x31   :  { %359 = vmatpush.bf16.msrb.mxu1 %v1907_v29 }
  0x32   :  { %466 = vmatpush.bf16.msrb.mxu3 %v1922_v39 }
  0x36   :  { %467 = vmatpush.bf16.msrb.mxu3 %v1921_v40 }
  0x3a   :  { %468 = vmatpush.bf16.msrb.mxu3 %v1920_v3  ;;  %v1933_v3 = vld [vmem:[%s2450_s11] sm:$0xff] }
  0x3e   :  { %469 = vmatpush.bf16.msrb.mxu3 %v1919_v5  ;;  %v1935_v5 = vld [vmem:[%s2450_s11 + $0x10] sm:$0xff] }
  0x91   :  { %v89_v30 = vpop.f32.mrf.mxu0  ;;  %v124_v31 = vpop.f32.mrf.mxu1 }
  0x92   :  { %v93_v32 = vpack.c.bf16 %v89_v30, %v89_v30  ;;  %v128_v33 = vpack.c.bf16 %v124_v31, %v124_v31  ;;  %v593_v30 = vld [vmem:[%s2447_s7] sm:$0x1]  ;;  %v1678_v31 = vld [vmem:[%s2447_s7 + $0x1] sm:$0x1] }
  0x94   :  { %202 = vmatmul.bf16.vlgmr.msra.gmra.mxu2 %v128_v33  ;;  %263 = vmatmul.bf16.vlgmr.msra.gmra.mxu3 %v93_v32  ;;  %v1702_v32 = vld [vmem:[%s2447_s7 + $0x2] sm:$0x1] }
  0x95   :  { %v1927_v33 = vld [vmem:[%s2446_s8] sm:$0xff] }
  0x99   :  { %v91_v34 = vpop.f32.mrf.mxu0  ;;  %v126_v35 = vpop.f32.mrf.mxu1 }
  0x9a   :  { %v1930_v34 = vld [vmem:[%s2446_s8 + $0x18] sm:$0xff]  ;;  %v1929_v35 = vld [vmem:[%s2446_s8 + $0x10] sm:$0xff] }
  0xa1   :  { %v282_v36 = vpop.f32.mrf.mxu0 }
  0xa2   :  { %v286_v37 = vpack.c.bf16 %v282_v36, %v282_v36  ;;  %v1932_v36 = vld [vmem:[%s2446_s8 + $0x28] sm:$0xff] }
  0xa4   :  { %360 = vmatmul.bf16.vlgmr.msrb.gmra.mxu1 %v286_v37  ;;  %v1931_v37 = vld [vmem:[%s2446_s8 + $0x20] sm:$0xff] }
  0xa9   :  { %v284_v38 = vpop.f32.mrf.mxu0 }
 0x117   :  { %v203_v41 = vpop.f32.mrf.mxu2  ;;  %v264_v42 = vpop.f32.mrf.mxu3 }
 0x118   :  { %v265_v45 = vadd.f32 %v264_v42, %v203_v41 }
 0x11f   :  { %v205_v43 = vpop.f32.mrf.mxu2  ;;  %v266_v44 = vpop.f32.mrf.mxu3 }
 0x121   :  { %v361_v47 = vpop.f32.mrf.mxu1 }
 0x122   :  { %v365_v48 = vadd.f32 %v361_v47, %v265_v45 }
 0x124   :  { %v370_v49 = vadd.f32 %v1960_v46, %v365_v48 }
 0x126   :  { %vm371_vm1 = vcmp.ge.f32.partialorder %v370_v49, 0.0  ;;  %v372_v50 = vmul.f32 0.2, %v370_v49 }
 0x128   :  { %v2187_v51 = vsel %vm371_vm1, %v370_v49, %v372_v50 }
 0x129   :  { %v363_v52 = vpop.f32.mrf.mxu1  ;;  %v374_v53 = vpack.c.bf16 %v2187_v51, %v2187_v51 }
 0x12b   :  { %v382_v56 = vsel %vm380_vm2, %v374_v53, 0  ;;  %v1962_v53 = vld [vmem:[%s2448_s9] ss:$0 sm:$0xff] }
 0x12c   :  { %391 = vmatpush.bf16.msra.mxu0 %v382_v56  ;;  %418 = vmatpush.bf16.msrb.mxu2 %v382_v56 }
 0x12d   :  { %527 = vmatpush.bf16.msra.mxu1 %v382_v56 }
 0x12f   :  { %1607 = vmatmul.msk.bf16.vlgmr.msrb.gmra.mxu2 %vm376_vm3, %v1606_v57  ;;  %1605 = vmatmul.msk.bf16.vlgmr.msra.gmra.mxu0 %vm376_vm3, %v375_v58 }
 0x130   :  { %574 = vmatpush.bf16.msra.mxu2 %v1926_v54  ;;  %506 = vmatpush.bf16.msrb.mxu0 %v1918_v55 }
 0x131   :  { %1651 = vmatmul.msk.bf16.vlgmr.msra.gmra.mxu1 %vm376_vm3, %v1650_v59 }
 0x132   :  { %666 = vmatpush.bf16.msrb.mxu1 %v1930_v34  ;;  %v1936_v34 = vld [vmem:[%s2453_s14] sm:$0xff] }
 0x134   :  { %575 = vmatpush.bf16.msra.mxu2 %v1925_v60  ;;  %507 = vmatpush.bf16.msrb.mxu0 %v1917_v61 }
 0x136   :  { %667 = vmatpush.bf16.msrb.mxu1 %v1929_v35  ;;  %v1937_v35 = vld [vmem:[%s2453_s14 + $0x8] sm:$0xff] }
 0x138   :  { %576 = vmatpush.bf16.msra.mxu2 %v1924_v62  ;;  %508 = vmatpush.bf16.msrb.mxu0 %v1916_v63  ;;  %v763_v62 = vld [vmem:[%s2449_s10] sm:$0x1]  ;;  %v1718_v63 = vld [vmem:[%s2449_s10 + $0x1] sm:$0x1] }
 0x13c   :  { %577 = vmatpush.bf16.msra.mxu2 %v1923_v2  ;;  %509 = vmatpush.bf16.msrb.mxu0 %v1915_v4  ;;  %v1732_v2 = vld [vmem:[%s2449_s10 + $0x2] sm:$0x1]  ;;  %v1934_v4 = vld [vmem:[%s2450_s11 + $0x8] sm:$0xff] }
 0x140   :  { %694 = vmatpush.bf16.msrb.mxu2 %v1928_v19 }
 0x144   :  { %695 = vmatpush.bf16.msrb.mxu2 %v1927_v33  ;;  %v1756_v33 = vld [vmem:[%s2452_s13 + $0x4] sm:$0x3] }
 0x1ac   :  { %v393_v6 = vpop.f32.mrf.mxu0 }
 0x1ad   :  { %v397_v8 = vpack.c.bf16 %v393_v6, %v393_v6 }
 0x1ae   :  { %v529_v7 = vpop.f32.mrf.mxu1 }
 0x1af   :  { %v533_v9 = vpack.c.bf16 %v529_v7, %v529_v7  ;;  %1649 = vmatmul.msk.bf16.vlgmr.msrb.gmra.mxu0 %vm458_vm4, %v397_v8 }
 0x1b1   :  { %1676 = vmatmul.msk.bf16.vlgmr.msra.gmra.mxu2 %vm458_vm4, %v533_v9 }
 0x1b2   :  { %v420_v10 = vpop.f32.mrf.mxu2 }
 0x1b3   :  { %v424_v11 = vpack.c.bf16 %v420_v10, %v420_v10 }
 0x1b4   :  { %v395_v12 = vpop.f32.mrf.mxu0 }
 0x1b5   :  { %1632 = vmatmul.msk.bf16.vlgmr.msrb.gmra.mxu3 %vm458_vm4, %v424_v11 }
 0x1b6   :  { %v531_v13 = vpop.f32.mrf.mxu1 }
 0x1ba   :  { %v422_v14 = vpop.f32.mrf.mxu2 }
 0x22c   :  { %v511_v15 = vpop.f32.mrf.mxu0 }
 0x234   :  { %v579_v16 = vpop.f32.mrf.mxu2  ;;  %v513_v17 = vpop.f32.mrf.mxu0 }
 0x238   :  { %v471_v18 = vpop.f32.mrf.mxu3 }
 0x239   :  { %v512_v20 = vadd.f32 %v511_v15, %v471_v18 }
 0x23b   :  { %v583_v22 = vadd.f32 %v579_v16, %v512_v20  ;;  %v1963_v20 = vld [vmem:[%s2451_s12] ss:$0 sm:$0xff] }
 0x23c   :  { %v581_v23 = vpop.f32.mrf.mxu2 }
 0x23d   :  { %v588_v24 = vadd.f32 %v1961_v21, %v583_v22 }
 0x23f   :  { %v590_v25 = vmul.f32 0.2, %v588_v24  ;;  %vm589_vm5 = vcmp.ge.f32.partialorder %v588_v24, 0.0 }
 0x240   :  { %v473_v26 = vpop.f32.mrf.mxu3 }
 0x241   :  { %v2243_v27 = vsel %vm589_vm5, %v588_v24, %v590_v25 }
 0x242   :  { %v592_v28 = vpack.c.bf16 %v2243_v27, %v2243_v27 }
 0x244   :  { %v600_v29 = vsel %vm598_vm6, %v592_v28, 0 }
 0x245   :  { %609 = vmatpush.bf16.msra.mxu3 %v600_v29  ;;  %632 = vmatpush.bf16.msra.mxu0 %v600_v29 }
 0x248   :  { %1677 = vmatmul.msk.bf16.vlgmr.msra.gmra.mxu3 %vm594_vm7, %v593_v30  ;;  %1679 = vmatmul.msk.bf16.vlgmr.msra.gmra.mxu0 %vm594_vm7, %v1678_v31  ;;  %v909_v31 = vld [vmem:[%s2452_s13] sm:$0x3] }
 0x249   :  { %713 = vmatpush.bf16.msrb.mxu3 %v600_v29  ;;  %746 = vmatpush.bf16.msrb.mxu0 %v1932_v36  ;;  %v1938_v36 = vld [vmem:[%s2453_s14 + $0x10] sm:$0xff] }
 0x24d   :  { %747 = vmatpush.bf16.msrb.mxu0 %v1931_v37  ;;  %826 = vmatpush.bf16.msra.mxu3 %v1934_v4  ;;  %v1942_v4 = vld [vmem:[%s2455_s17 + $0x18] sm:$0xff] }
 0x251   :  { %848 = vmatpush.bf16.msra.mxu0 %v1933_v3  ;;  %v1939_v3 = vld [vmem:[%s2455_s17] sm:$0xff] }
 0x258   :  { %1703 = vmatmul.msk.bf16.vlgmr.msrb.gmra.mxu3 %vm594_vm7, %v1702_v32  ;;  %v1742_v32 = vld [vmem:[%s2452_s13 + $0x2] sm:$0x3] }
 0x2c5   :  { %v634_v38 = vpop.f32.mrf.mxu0 }
 0x2c6   :  { %v638_v39 = vpack.c.bf16 %v634_v38, %v634_v38 }
 0x2c8   :  { %1692 = vmatmul.msk.bf16.vlgmr.msrb.gmra.mxu1 %vm656_vm8, %v638_v39 }
 0x2cb   :  { %v611_v40 = vpop.f32.mrf.mxu3 }
 0x2cc   :  { %v615_v41 = vpack.c.bf16 %v611_v40, %v611_v40 }
 0x2cd   :  { %v636_v42 = vpop.f32.mrf.mxu0 }
 0x2ce   :  { %1701 = vmatmul.msk.bf16.vlgmr.msrb.gmra.mxu2 %vm656_vm8, %v615_v41 }
 0x2d3   :  { %v613_v43 = vpop.f32.mrf.mxu3 }
 0x2db   :  { %v715_v44 = vpop.f32.mrf.mxu3 }
 0x2dc   :  { %v719_v45 = vpack.c.bf16 %v715_v44, %v715_v44 }
 0x2de   :  { %1716 = vmatmul.msk.bf16.vlgmr.msrb.gmra.mxu0 %vm656_vm8, %v719_v45 }
 0x2e3   :  { %v717_v46 = vpop.f32.mrf.mxu3 }
 0x345   :  { %v669_v47 = vpop.f32.mrf.mxu1 }
 0x34d   :  { %v671_v48 = vpop.f32.mrf.mxu1 }
 0x351   :  { %v697_v49 = vpop.f32.mrf.mxu2 }
 0x352   :  { %v698_v52 = vadd.f32 %v697_v49, %v669_v47 }
 0x359   :  { %v699_v50 = vpop.f32.mrf.mxu2 }
 0x35b   :  { %v749_v54 = vpop.f32.mrf.mxu0 }
 0x35c   :  { %v753_v55 = vadd.f32 %v749_v54, %v698_v52  ;;  %v1964_v52 = vld [vmem:[%s2454_s15] ss:$0 sm:$0xff]  ;;  %v1940_v54 = vld [vmem:[%s2455_s17 + $0x8] sm:$0xff] }
 0x35e   :  { %v758_v56 = vadd.f32 %v1962_v53, %v753_v55 }
 0x360   :  { %vm759_vm9 = vcmp.ge.f32.partialorder %v758_v56, 0.0  ;;  %v760_v57 = vmul.f32 0.2, %v758_v56 }
 0x362   :  { %v761_v58 = vsel %vm759_vm9, %v758_v56, %v760_v57 }
 0x363   :  { %v751_v59 = vpop.f32.mrf.mxu0  ;;  %v762_v60 = vpack.c.bf16 %v761_v58, %v761_v58 }
 0x365   :  { %v770_v61 = vsel %vm768_vm10, %v762_v60, 0 }
 0x366   :  { %779 = vmatpush.bf16.msra.mxu1 %v770_v61  ;;  %800 = vmatpush.bf16.msra.mxu2 %v770_v61 }
 0x369   :  { %1717 = vmatmul.msk.bf16.vlgmr.msra.gmra.mxu1 %vm764_vm11, %v763_v62  ;;  %1719 = vmatmul.msk.bf16.vlgmr.msra.gmra.mxu2 %vm764_vm11, %v1718_v63  ;;  %v1053_v63 = vld [vmem:[%s2456_s16] sm:$0xf] }
 0x36a   :  { %866 = vmatpush.bf16.msrb.mxu1 %v770_v61  ;;  %892 = vmatpush.bf16.msrb.mxu2 %v1935_v5  ;;  %v1941_v5 = vld [vmem:[%s2455_s17 + $0x10] sm:$0xff] }
 0x36e   :  { %992 = vmatpush.bf16.msra.mxu2 %v1936_v34  ;;  %970 = vmatpush.bf16.msra.mxu1 %v1937_v35  ;;  %v1945_v34 = vld [vmem:[%s2459_s19] sm:$0xff]  ;;  %v1950_v35 = vld [vmem:[%s2459_s19 + $0x8] sm:$0xff] }
 0x379   :  { %1733 = vmatmul.msk.bf16.vlgmr.msrb.gmra.mxu1 %vm764_vm11, %v1732_v2  ;;  %v1766_v2 = vld [vmem:[%s2456_s16 + $0x4] sm:$0xf] }
 0x3e6   :  { %v781_v6 = vpop.f32.mrf.mxu1 }
 0x3e7   :  { %v785_v7 = vpack.c.bf16 %v781_v6, %v781_v6  ;;  %v1944_v6 = vld [vmem:[%s2455_s17 + $0x28] sm:$0xff] }
 0x3e9   :  { %1731 = vmatmul.msk.bf16.vlgmr.msra.gmra.mxu0 %vm76_vm0, %v785_v7  ;;  %v1943_v7 = vld [vmem:[%s2455_s17 + $0x20] sm:$0xff] }
 0x3ec   :  { %v802_v8 = vpop.f32.mrf.mxu2 }
 0x3ed   :  { %v806_v9 = vpack.c.bf16 %v802_v8, %v802_v8 }
 0x3ee   :  { %v783_v10 = vpop.f32.mrf.mxu1 }
 0x3ef   :  { %1726 = vmatmul.msk.bf16.vlgmr.msra.gmra.mxu3 %vm76_vm0, %v806_v9 }
 0x3f4   :  { %v804_v11 = vpop.f32.mrf.mxu2 }
 0x3f6   :  { %v868_v12 = vpop.f32.mrf.mxu1 }
 0x3f7   :  { %v872_v13 = vpack.c.bf16 %v868_v12, %v868_v12 }
 0x3f9   :  { %1740 = vmatmul.msk.bf16.vlgmr.msrb.gmra.mxu2 %vm76_vm0, %v872_v13 }
 0x3fe   :  { %v870_v14 = vpop.f32.mrf.mxu1 }
 0x466   :  { %v850_v15 = vpop.f32.mrf.mxu0 }
 0x46e   :  { %v852_v16 = vpop.f32.mrf.mxu0 }
 0x472   :  { %v828_v17 = vpop.f32.mrf.mxu3 }
 0x473   :  { %v851_v19 = vadd.f32 %v850_v15, %v828_v17 }
 0x47a   :  { %v830_v18 = vpop.f32.mrf.mxu3 }
 0x47c   :  { %v894_v21 = vpop.f32.mrf.mxu2 }
 0x47d   :  { %v898_v22 = vadd.f32 %v894_v21, %v851_v19 }
 0x47f   :  { %v903_v23 = vadd.f32 %v1963_v20, %v898_v22  ;;  %v1965_v22 = vld [vmem:[%s2457_s18] ss:$0 sm:$0xff] }
 0x481   :  { %vm904_vm12 = vcmp.ge.f32.partialorder %v903_v23, 0.0  ;;  %v905_v24 = vmul.f32 0.2, %v903_v23 }
 0x483   :  { %v906_v25 = vsel %vm904_vm12, %v903_v23, %v905_v24  ;;  %v1949_v24 = vld [vmem:[%s2458_s20 + $0x18] sm:$0xff] }
 0x484   :  { %v896_v26 = vpop.f32.mrf.mxu2  ;;  %v907_v28 = vadd.f32 %v906_v25, %v761_v58 }
 0x486   :  { %v908_v29 = vpack.c.bf16 %v907_v28, %v907_v28 }
 0x488   :  { %v914_v30 = vsel %vm768_vm10, %v908_v29, 0 }
 0x489   :  { %923 = vmatpush.bf16.msrb.mxu3 %v914_v30  ;;  %944 = vmatpush.bf16.msrb.mxu0 %v914_v30 }
 0x48c   :  { %1741 = vmatmul.msk.bf16.vlgmr.msrb.gmra.mxu3 %vm764_vm11, %v909_v31  ;;  %1743 = vmatmul.msk.bf16.vlgmr.msrb.gmra.mxu0 %vm764_vm11, %v1742_v32 }
 0x48d   :  { %1010 = vmatpush.bf16.msra.mxu3 %v914_v30  ;;  %1036 = vmatpush.bf16.msra.mxu0 %v1938_v36  ;;  %v1954_v36 = vld [vmem:[%s2458_s20 + $0x38] sm:$0xff] }
 0x491   :  { %1151 = vmatpush.bf16.msrb.mxu0 %v1940_v54  ;;  %1123 = vmatpush.bf16.msrb.mxu3 %v1942_v4 }
 0x495   :  { %1152 = vmatpush.bf16.msrb.mxu0 %v1939_v3  ;;  %1124 = vmatpush.bf16.msrb.mxu3 %v1941_v5 }
 0x49c   :  { %1757 = vmatmul.msk.bf16.vlgmr.msra.gmra.mxu3 %vm764_vm11, %v1756_v33 }
 0x509   :  { %v946_v37 = vpop.f32.mrf.mxu0 }
 0x50a   :  { %v950_v38 = vpack.c.bf16 %v946_v37, %v946_v37  ;;  %v1953_v37 = vld [vmem:[%s2458_s20 + $0x30] sm:$0xff] }
 0x50c   :  { %1750 = vmatmul.msk.bf16.vlgmr.msra.gmra.mxu1 %vm76_vm0, %v950_v38  ;;  %v1948_v38 = vld [vmem:[%s2458_s20 + $0x10] sm:$0xff] }
 0x50f   :  { %v925_v39 = vpop.f32.mrf.mxu3 }
 0x510   :  { %v929_v40 = vpack.c.bf16 %v925_v39, %v925_v39  ;;  %v1947_v39 = vld [vmem:[%s2458_s20 + $0x8] sm:$0xff] }
 0x511   :  { %v948_v41 = vpop.f32.mrf.mxu0 }
 0x512   :  { %1755 = vmatmul.msk.bf16.vlgmr.msra.gmra.mxu2 %vm76_vm0, %v929_v40  ;;  %v1952_v40 = vld [vmem:[%s2458_s20 + $0x28] sm:$0xff]  ;;  %v1951_v41 = vld [vmem:[%s2458_s20 + $0x20] sm:$0xff] }
 0x517   :  { %v927_v42 = vpop.f32.mrf.mxu3 }
 0x518   :  { %v1946_v42 = vld [vmem:[%s2458_s20] sm:$0xff] }
 0x51f   :  { %v1012_v43 = vpop.f32.mrf.mxu3 }
 0x520   :  { %v1016_v44 = vpack.c.bf16 %v1012_v43, %v1012_v43  ;;  %v1959_v43 = vld [vmem:[%s2458_s20 + $0x58] sm:$0xff] }
 0x522   :  { %1764 = vmatmul.msk.bf16.vlgmr.msra.gmra.mxu0 %vm76_vm0, %v1016_v44  ;;  %v1958_v44 = vld [vmem:[%s2458_s20 + $0x50] sm:$0xff] }
 0x527   :  { %v1014_v45 = vpop.f32.mrf.mxu3 }
 0x528   :  { %v1957_v45 = vld [vmem:[%s2458_s20 + $0x48] sm:$0xff] }
 0x589   :  { %v972_v46 = vpop.f32.mrf.mxu1 }
 0x591   :  { %v974_v47 = vpop.f32.mrf.mxu1 }
 0x595   :  { %v994_v48 = vpop.f32.mrf.mxu2 }
 0x596   :  { %v995_v50 = vadd.f32 %v994_v48, %v972_v46  ;;  %v1956_v46 = vld [vmem:[%s2458_s20 + $0x40] sm:$0xff] }
 0x59d   :  { %v996_v49 = vpop.f32.mrf.mxu2 }
 0x59f   :  { %v1038_v53 = vpop.f32.mrf.mxu0 }
 0x5a0   :  { %v1042_v55 = vadd.f32 %v1038_v53, %v995_v50 }
 0x5a2   :  { %v1047_v56 = vadd.f32 %v1964_v52, %v1042_v55 }
 0x5a4   :  { %vm1048_vm13 = vcmp.ge.f32.partialorder %v1047_v56, 0.0  ;;  %v1049_v57 = vmul.f32 0.2, %v1047_v56 }
 0x5a6   :  { %v1050_v58 = vsel %vm1048_vm13, %v1047_v56, %v1049_v57 }
 0x5a7   :  { %v1040_v59 = vpop.f32.mrf.mxu0  ;;  %v1051_v60 = vadd.f32 %v1050_v58, %v2243_v27  ;;  %v1790_v27 = vld [vmem:[%s2456_s16 + $0x8] sm:$0xf] }
 0x5a9   :  { %v1052_v61 = vpack.c.bf16 %v1051_v60, %v1051_v60  ;;  %v1966_v60 = vld [vmem:[%s2460_s21] ss:$0 sm:$0xff] }
 0x5ab   :  { %v1058_v62 = vsel %vm598_vm6, %v1052_v61, 0 }
 0x5ac   :  { %1067 = vmatpush.bf16.msrb.mxu1 %v1058_v62  ;;  %1090 = vmatpush.bf16.msrb.mxu2 %v1058_v62 }
 0x5af   :  { %1765 = vmatmul.msk.bf16.vlgmr.msrb.gmra.mxu1 %vm594_vm7, %v1053_v63  ;;  %1767 = vmatmul.msk.bf16.vlgmr.msrb.gmra.mxu2 %vm594_vm7, %v1766_v2 }
 0x5b0   :  { %1170 = vmatpush.bf16.msra.mxu1 %v1058_v62  ;;  %1203 = vmatpush.bf16.msra.mxu2 %v1944_v6 }
 0x5b4   :  { %1204 = vmatpush.bf16.msra.mxu2 %v1943_v7  ;;  %1323 = vmatpush.bf16.msrb.mxu1 %v1954_v36 }
 0x5b8   :  { %1364 = vmatpush.bf16.msrb.mxu2 %v1949_v24  ;;  %1324 = vmatpush.bf16.msrb.mxu1 %v1953_v37 }
 0x5bc   :  { %1365 = vmatpush.bf16.msrb.mxu2 %v1948_v38  ;;  %1325 = vmatpush.bf16.msrb.mxu1 %v1952_v40 }
 0x5bf   :  { %1791 = vmatmul.msk.bf16.vlgmr.msra.gmra.mxu1 %vm594_vm7, %v1790_v27 }
 0x5c0   :  { %1366 = vmatpush.bf16.msrb.mxu2 %v1947_v39  ;;  %1326 = vmatpush.bf16.msrb.mxu1 %v1951_v41 }
 0x5c4   :  { %1367 = vmatpush.bf16.msrb.mxu2 %v1946_v42 }
 0x62c   :  { %v1069_v8 = vpop.f32.mrf.mxu1 }
 0x62d   :  { %v1073_v9 = vpack.c.bf16 %v1069_v8, %v1069_v8 }
 0x62f   :  { %1789 = vmatmul.msk.bf16.vlgmr.msrb.gmra.mxu0 %vm656_vm8, %v1073_v9 }
 0x632   :  { %v1092_v10 = vpop.f32.mrf.mxu2 }
 0x633   :  { %v1096_v11 = vpack.c.bf16 %v1092_v10, %v1092_v10 }
 0x634   :  { %v1071_v12 = vpop.f32.mrf.mxu1 }
 0x635   :  { %1780 = vmatmul.msk.bf16.vlgmr.msrb.gmra.mxu3 %vm656_vm8, %v1096_v11 }
 0x63a   :  { %v1094_v13 = vpop.f32.mrf.mxu2 }
 0x63c   :  { %v1172_v14 = vpop.f32.mrf.mxu1 }
 0x63d   :  { %v1176_v15 = vpack.c.bf16 %v1172_v14, %v1172_v14 }
 0x63f   :  { %1804 = vmatmul.msk.bf16.vlgmr.msra.gmra.mxu2 %vm656_vm8, %v1176_v15 }
 0x644   :  { %v1174_v16 = vpop.f32.mrf.mxu1 }
 0x6ac   :  { %v1154_v17 = vpop.f32.mrf.mxu0 }
 0x6b4   :  { %v1156_v18 = vpop.f32.mrf.mxu0 }
 0x6b8   :  { %v1126_v19 = vpop.f32.mrf.mxu3 }
 0x6b9   :  { %v1155_v21 = vadd.f32 %v1154_v17, %v1126_v19 }
 0x6c0   :  { %v1128_v20 = vpop.f32.mrf.mxu3 }
 0x6c2   :  { %v1206_v23 = vpop.f32.mrf.mxu2 }
 0x6c3   :  { %v1210_v25 = vadd.f32 %v1206_v23, %v1155_v21 }
 0x6c5   :  { %v1215_v26 = vadd.f32 %v1965_v22, %v1210_v25 }
 0x6c7   :  { %vm1216_vm14 = vcmp.ge.f32.partialorder %v1215_v26, 0.0  ;;  %v1217_v28 = vmul.f32 0.2, %v1215_v26 }
 0x6c9   :  { %v1218_v29 = vsel %vm1216_vm14, %v1215_v26, %v1217_v28 }
 0x6ca   :  { %v1208_v30 = vpop.f32.mrf.mxu2  ;;  %v1219_v31 = vadd.f32 %v1218_v29, %v2187_v51  ;;  %v1955_v51 = vld [vmem:[%s2459_s19 + $0x10] sm:$0xff] }
 0x6cc   :  { %v1220_v32 = vpack.c.bf16 %v1219_v31, %v1219_v31 }
 0x6ce   :  { %v1232_v33 = vsel %vm380_vm2, %v1220_v32, 0 }
 0x6cf   :  { %1241 = vmatpush.bf16.msra.mxu3 %v1232_v33  ;;  %1275 = vmatpush.bf16.msra.mxu0 %v1232_v33 }
 0x6d2   :  { %1809 = vmatmul.msk.bf16.vlgmr.msra.gmra.mxu3 %vm376_vm3, %v1945_v34  ;;  %1816 = vmatmul.msk.bf16.vlgmr.msra.gmra.mxu0 %vm376_vm3, %v1950_v35 }
 0x6d3   :  { %1392 = vmatpush.bf16.msrb.mxu3 %v1232_v33  ;;  %1440 = vmatpush.bf16.msrb.mxu0 %v1959_v43 }
 0x6d7   :  { %1441 = vmatpush.bf16.msrb.mxu0 %v1958_v44 }
 0x6db   :  { %1442 = vmatpush.bf16.msrb.mxu0 %v1957_v45 }
 0x6df   :  { %1443 = vmatpush.bf16.msrb.mxu0 %v1956_v46 }
 0x6e2   :  { %1865 = vmatmul.msk.bf16.vlgmr.msrb.gmra.mxu3 %vm376_vm3, %v1955_v51 }
 0x74f   :  { %v1277_v47 = vpop.f32.mrf.mxu0 }
 0x755   :  { %v1243_v48 = vpop.f32.mrf.mxu3 }
 0x757   :  { %v1279_v49 = vpop.f32.mrf.mxu0 }
 0x758   :  { %v1282_v50 = vpack.c.bf16 %v1279_v49, %v1277_v47 }
 0x75a   :  { %1841 = vmatmul.msk.bf16.vlgmr.msrb.gmra.mxu1 %vm458_vm4, %v1282_v50 }
 0x75d   :  { %v1245_v52 = vpop.f32.mrf.mxu3 }
 0x75e   :  { %v1248_v53 = vpack.c.bf16 %v1245_v52, %v1243_v48 }
 0x760   :  { %1858 = vmatmul.msk.bf16.vlgmr.msrb.gmra.mxu2 %vm458_vm4, %v1248_v53 }
 0x765   :  { %v1394_v54 = vpop.f32.mrf.mxu3 }
 0x76d   :  { %v1396_v55 = vpop.f32.mrf.mxu3 }
 0x76e   :  { %v1399_v56 = vpack.c.bf16 %v1396_v55, %v1394_v54 }
 0x770   :  { %1890 = vmatmul.msk.bf16.vlgmr.msrb.gmra.mxu0 %vm458_vm4, %v1399_v56 }
 0x7d7   :  { %v1328_v58 = vpop.f32.mrf.mxu1 }
 0x7df   :  { %v1330_v3 = vpop.f32.mrf.mxu1 }
 0x7e3   :  { %v1369_v57 = vpop.f32.mrf.mxu2 }
 0x7e4   :  { %v1370_v59 = vadd.f32 %v1369_v57, %v1328_v58 }
 0x7eb   :  { %v1371_v2 = vpop.f32.mrf.mxu2 }
 0x7ec   :  { %v1372_v4 = vadd.f32 %v1371_v2, %v1330_v3 }
 0x7ed   :  { %v1445_v61 = vpop.f32.mrf.mxu0 }
 0x7ee   :  { %v1450_v62 = vadd.f32 %v1445_v61, %v1370_v59 }
 0x7f0   :  { %v1456_v63 = vadd.f32 %v1966_v60, %v1450_v62 }
 0x7f2   :  { %vm1458_vm15 = vcmp.ge.f32.partialorder %v1456_v63, 0.0  ;;  %v1460_v27 = vmul.f32 0.2, %v1456_v63 }
 0x7f4   :  { %v1462_v5 = vsel %vm1458_vm15, %v1456_v63, %v1460_v27 }
 0x7f5   :  { %v1464_v6 = vadd.f32 %v1462_v5, %v2085_v0  ;;  %v1447_v7 = vpop.f32.mrf.mxu0 }
 0x7f6   :  { %v1451_v8 = vadd.f32 %v1447_v7, %v1372_v4 }
 0x7f7   :  { %1466 = vst [vmem:[%s2461_s22] sm:$0xff] %v1464_v6 }
 0x7f8   :  { %v1457_v9 = vadd.f32 %v1966_v60, %v1451_v8 }
 0x7fa   :  { %vm1459_vm0 = vcmp.ge.f32.partialorder %v1457_v9, 0.0  ;;  %v1461_v10 = vmul.f32 0.2, %v1457_v9 }
 0x7fc   :  { %v1463_v11 = vsel %vm1459_vm0, %v1457_v9, %v1461_v10 }
 0x7fd   :  { %v1465_v12 = vadd.f32 %v1463_v11, %v2090_v1 }
 0x7ff   :  { %1467 = vst [vmem:[%s2461_s22 + $0x8] sm:$0xff] %v1465_v12 }

</bundles_post_ra>
